<compile_context>
chip_gen: v6e
topology: v6e:2x2x1
jax: 0.10.0
libtpu: 0.0.40
codegen_flags: <defaults>
</compile_context>

<pallas_src>
import functools

import jax
import jax.numpy as jnp
from jax.experimental import pallas as pl
from jax.experimental.pallas import tpu as pltpu


# ---------------------------------------------------------------------------
# In-kernel helpers
# ---------------------------------------------------------------------------

def _ln_f32(x, gamma, beta, eps):
    """Row-wise LayerNorm in f32 (biased variance, matches nn.LayerNorm)."""
    mean = jnp.mean(x, axis=-1, keepdims=True)
    var = jnp.mean(jnp.square(x - mean), axis=-1, keepdims=True)
    return (x - mean) * jax.lax.rsqrt(var + eps) * gamma + beta


# ---------------------------------------------------------------------------
# Fused encoder kernel: grid = (batch_blocks, num_layers)
# ---------------------------------------------------------------------------

def _encoder_kernel(x_ref, mask_ref, embg_ref, embb_ref,
                    qkvw_ref, qkvb_ref, aow_ref, aob_ref,
                    ln1g_ref, ln1b_ref, iw_ref, ib_ref,
                    ow_ref, ob_ref, ln2g_ref, ln2b_ref,
                    o_ref, *, num_heads, eps):
    l = pl.program_id(1)
    Bt, S, H = o_ref.shape
    nh = num_heads
    dh = H // nh

    # ---- layer 0: fold the embedding LayerNorm into the carry init ----
    @pl.when(l == 0)
    def _():
        xe = x_ref[...].astype(jnp.float32)                      # [Bt, S, H]
        o_ref[...] = _ln_f32(xe, embg_ref[...], embb_ref[...], eps).astype(o_ref.dtype)

    # carry (bf16 in VMEM across the layer axis) -> f32 working copy
    x = o_ref[...].astype(jnp.float32)                           # [Bt, S, H]
    xf = x.reshape(Bt * S, H)

    # ---- fused QKV projection (1/sqrt(dh) already folded into Q cols) ----
    qkv = jnp.dot(xf.astype(jnp.bfloat16), qkvw_ref[0],
                  preferred_element_type=jnp.float32) + qkvb_ref[0]   # [Bt*S, 3H]

    q = qkv[:, :H].reshape(Bt, S, nh, dh)
    k = qkv[:, H:2 * H].reshape(Bt, S, nh, dh)
    v = qkv[:, 2 * H:].reshape(Bt, S, nh, dh)

    add_mask = mask_ref[...]                                     # [Bt, 1, S] additive

    # ---- per-sample attention, batched over heads (no per-head slicing) ----
    ctx_rows = []
    for b in range(Bt):                                          # small static unroll
        qh = pltpu.einshape('snd->nsd', q[b].astype(jnp.bfloat16))   # [nh, S, dh]
        kh = pltpu.einshape('snd->nsd', k[b].astype(jnp.bfloat16))
        vh = pltpu.einshape('snd->nsd', v[b].astype(jnp.bfloat16))
        s = jnp.einsum('nqd,nkd->nqk', qh, kh,
                       preferred_element_type=jnp.float32)           # [nh, S, S]
        s = s + add_mask[b]                                          # broadcast over q rows
        m = jnp.max(s, axis=-1, keepdims=True)
        p = jnp.exp(s - m)
        denom = jnp.sum(p, axis=-1, keepdims=True)
        p = p * pl.reciprocal(denom, approx=False)                   # exact (verification)
        ctx = jnp.einsum('nqk,nkd->nqd', p.astype(jnp.bfloat16), vh,
                         preferred_element_type=jnp.float32)         # [nh, S, dh]
        ctx_rows.append(pltpu.einshape('nsd->snd', ctx).reshape(S, H))
    ctx_all = jnp.concatenate(ctx_rows, axis=0) if Bt > 1 else ctx_rows[0]  # [Bt*S, H]

    # ---- attention output projection: ONE K=H matmul ----
    attn = jnp.dot(ctx_all.astype(jnp.bfloat16), aow_ref[0],
                   preferred_element_type=jnp.float32) + aob_ref[0]

    # ---- residual + LayerNorm 1 ----
    h1 = _ln_f32(attn + xf, ln1g_ref[0], ln1b_ref[0], eps)

    # ---- FFN (relu) + residual + LayerNorm 2 ----
    inter = jnp.dot(h1.astype(jnp.bfloat16), iw_ref[0],
                    preferred_element_type=jnp.float32) + ib_ref[0]
    inter = jnp.maximum(inter, 0.0)
    ffn = jnp.dot(inter.astype(jnp.bfloat16), ow_ref[0],
                  preferred_element_type=jnp.float32) + ob_ref[0]
    out = _ln_f32(ffn + h1, ln2g_ref[0], ln2b_ref[0], eps)

    o_ref[...] = out.reshape(Bt, S, H).astype(o_ref.dtype)


def _pick_batch_block(B, S, target_rows=256, max_unroll=4):
    """Largest divisor of B (<= max_unroll) keeping >=2 parallel blocks (v7x)."""
    best = 1
    for bt in range(1, min(B, max_unroll) + 1):
        if B % bt:
            continue
        if B >= 2 and B // bt < 2:      # keep two 'parallel' blocks for 2-TC chips
            continue
        if bt * S > max(target_rows, S):
            continue
        best = bt
    return best


def encoder_forward(embeddings, add_mask3, stacked, emb_g, emb_b, num_heads,
                    *, batch_block=None, eps=1e-12):
    """embeddings: [B,S,H] f32, add_mask3: [B,1,S] f32 -> hidden [B,S,H] bf16."""
    B, S, H = embeddings.shape
    L = stacked["qkv_w"].shape[0]
    I = stacked["i_w"].shape[2]
    assert H % num_heads == 0
    Bt = batch_block or _pick_batch_block(B, S)
    assert B % Bt == 0
    nb = B // Bt

    xmap = lambda b, l: (b, 0, 0)      # constant over l -> carried / not re-fetched
    wmap = lambda b, l: (l, 0, 0)      # per-layer weight slab (prefetched while computing)
    cmap = lambda b, l: (0, 0)

    return pl.pallas_call(
        functools.partial(_encoder_kernel, num_heads=num_heads, eps=eps),
        out_shape=jax.ShapeDtypeStruct((B, S, H), jnp.bfloat16),
        grid=(nb, L),
        in_specs=[
            pl.BlockSpec((Bt, S, H), xmap),           # raw embedding sum
            pl.BlockSpec((Bt, 1, S), xmap),           # additive attention mask
            pl.BlockSpec((1, H), cmap),               # embedding LN gamma
            pl.BlockSpec((1, H), cmap),               # embedding LN beta
            pl.BlockSpec((1, H, 3 * H), wmap),        # fused QKV weight (bf16)
            pl.BlockSpec((1, 1, 3 * H), wmap),        # fused QKV bias
            pl.BlockSpec((1, H, H), wmap),            # attn output proj weight
            pl.BlockSpec((1, 1, H), wmap),            # attn output proj bias
            pl.BlockSpec((1, 1, H), wmap),            # LN1 gamma
            pl.BlockSpec((1, 1, H), wmap),            # LN1 beta
            pl.BlockSpec((1, H, I), wmap),            # intermediate weight
            pl.BlockSpec((1, 1, I), wmap),            # intermediate bias
            pl.BlockSpec((1, I, H), wmap),            # FFN output weight
            pl.BlockSpec((1, 1, H), wmap),            # FFN output bias
            pl.BlockSpec((1, 1, H), wmap),            # LN2 gamma
            pl.BlockSpec((1, 1, H), wmap),            # LN2 beta
        ],
        out_specs=pl.BlockSpec((Bt, S, H), xmap),     # VMEM-resident carry over l
        compiler_params=pltpu.CompilerParams(
            dimension_semantics=("parallel", "arbitrary"),
            vmem_limit_bytes=32 * 1024 * 1024),       # safe on v5e/v6e/v7x
    )(embeddings, add_mask3, emb_g.reshape(1, H), emb_b.reshape(1, H),
      stacked["qkv_w"], stacked["qkv_b"], stacked["ao_w"], stacked["ao_b"],
      stacked["ln1_g"], stacked["ln1_b"], stacked["i_w"], stacked["i_b"],
      stacked["o_w"], stacked["o_b"], stacked["ln2_g"], stacked["ln2_b"])


# ---------------------------------------------------------------------------
# Parameters (canonical f32) + kernel-ready stacked/fused weights
# ---------------------------------------------------------------------------

def init_params(key, *, vocab_size, max_pos, type_vocab, hidden, intermediate,
                num_layers, num_classes):
    def nrm(k, shape):
        return jax.random.normal(k, shape, dtype=jnp.float32) * 0.02

    keys = iter(jax.random.split(key, 16 + num_layers * 16))
    p = {
        "word_embeddings": nrm(next(keys), (vocab_size, hidden)),
        "position_embeddings": nrm(next(keys), (max_pos, hidden)),
        "token_type_embeddings": nrm(next(keys), (type_vocab, hidden)),
        "emb_ln_g": jnp.ones((hidden,), jnp.float32),
        "emb_ln_b": jnp.zeros((hidden,), jnp.float32),
        "pool_w": nrm(next(keys), (hidden, hidden)),
        "pool_b": jnp.zeros((hidden,), jnp.float32),
        "cls_w": nrm(next(keys), (hidden, num_classes)),
        "cls_b": jnp.zeros((num_classes,), jnp.float32),
        "layers": [],
    }
    for _ in range(num_layers):
        p["layers"].append({
            "q_w": nrm(next(keys), (hidden, hidden)),
            "q_b": jnp.zeros((hidden,), jnp.float32),
            "k_w": nrm(next(keys), (hidden, hidden)),
            "k_b": jnp.zeros((hidden,), jnp.float32),
            "v_w": nrm(next(keys), (hidden, hidden)),
            "v_b": jnp.zeros((hidden,), jnp.float32),
            "ao_w": nrm(next(keys), (hidden, hidden)),
            "ao_b": jnp.zeros((hidden,), jnp.float32),
            "ln1_g": jnp.ones((hidden,), jnp.float32),
            "ln1_b": jnp.zeros((hidden,), jnp.float32),
            "i_w": nrm(next(keys), (hidden, intermediate)),
            "i_b": jnp.zeros((intermediate,), jnp.float32),
            "o_w": nrm(next(keys), (intermediate, hidden)),
            "o_b": jnp.zeros((hidden,), jnp.float32),
            "ln2_g": jnp.ones((hidden,), jnp.float32),
            "ln2_b": jnp.zeros((hidden,), jnp.float32),
        })
    return p


def stack_layers_for_kernel(layers, num_heads):
    """Stack per-layer weights on a leading L axis, fuse QKV, fold the
    1/sqrt(dh) score scale into the Q columns, cast matmul weights to bf16."""
    H = layers[0]["q_w"].shape[0]
    I = layers[0]["i_w"].shape[1]
    dh = H // num_heads
    scale = jnp.float32(1.0 / (dh ** 0.5))

    def stack(fn, dtype=None):
        a = jnp.stack([fn(l) for l in layers], axis=0)
        return a.astype(dtype) if dtype is not None else a

    return {
        "qkv_w": stack(lambda l: jnp.concatenate(
            [l["q_w"] * scale, l["k_w"], l["v_w"]], axis=1), jnp.bfloat16),   # [L,H,3H]
        "qkv_b": stack(lambda l: jnp.concatenate(
            [l["q_b"] * scale, l["k_b"], l["v_b"]]).reshape(1, 3 * H)),       # [L,1,3H]
        "ao_w": stack(lambda l: l["ao_w"], jnp.bfloat16),                      # [L,H,H]
        "ao_b": stack(lambda l: l["ao_b"].reshape(1, H)),
        "ln1_g": stack(lambda l: l["ln1_g"].reshape(1, H)),
        "ln1_b": stack(lambda l: l["ln1_b"].reshape(1, H)),
        "i_w": stack(lambda l: l["i_w"], jnp.bfloat16),                        # [L,H,I]
        "i_b": stack(lambda l: l["i_b"].reshape(1, I)),
        "o_w": stack(lambda l: l["o_w"], jnp.bfloat16),                        # [L,I,H]
        "o_b": stack(lambda l: l["o_b"].reshape(1, H)),
        "ln2_g": stack(lambda l: l["ln2_g"].reshape(1, H)),
        "ln2_b": stack(lambda l: l["ln2_b"].reshape(1, H)),
    }


# ---------------------------------------------------------------------------
# Model forward (glue in plain JAX, encoder = one fused Pallas kernel)
# ---------------------------------------------------------------------------

def transformer_forward(params, stacked, input_ids, input_mask, token_type_ids,
                        *, num_heads):
    B, S = input_ids.shape

    # --- embeddings (gather is glue; sum here, LayerNorm fused into the kernel) ---
    we = params["word_embeddings"][input_ids]                        # [B, S, H]
    pe = params["position_embeddings"][jnp.arange(S)][None, :, :]    # [1, S, H]
    te = params["token_type_embeddings"][token_type_ids]             # [B, S, H]
    emb = we + pe + te                                               # f32
    # dropout is identity in eval mode (self.model.eval())

    # extended attention mask: (1 - mask) * -10000, broadcast over heads/queries
    add_mask3 = ((1.0 - input_mask.astype(jnp.float32)) * -10000.0).reshape(B, 1, S)

    # --- encoder: ONE fused Pallas kernel over (batch blocks, layers) ---
    hidden = encoder_forward(emb, add_mask3, stacked,
                             params["emb_ln_g"], params["emb_ln_b"], num_heads)

    # --- pooler + classifier: a few rows -> plain JAX (launch cost >> compute) ---
    cls_tok = hidden[:, 0, :].astype(jnp.float32)                    # [B, H]
    pooled = jnp.tanh(cls_tok @ params["pool_w"] + params["pool_b"])
    logits = pooled @ params["cls_w"] + params["cls_b"]              # [B, classes]
    preds = jnp.argmax(logits, axis=1)
    return preds, logits


# ---------------------------------------------------------------------------
# Demo
# ---------------------------------------------------------------------------

if __name__ == "__main__":
    # small config consistent with the module's args
    B, S = 2, 8                 # batch, max_sent_length
    HIDDEN = 32                 # hidden_size (== embedding_size)
    INTER = 64                  # intermediate_size
    HEADS = 4                   # num_attention_heads
    LAYERS = 2                  # num_hidden_layers
    CLASSES = 2                 # num_classes
    VOCAB = 50
    TYPE_VOCAB = 2
    MAX_POS = 64

    # TODO(synk): vocab building / convert_examples_to_features (tokenization)
    # has no Pallas equivalent; synthetic token ids are used instead.
    key = jax.random.PRNGKey(0)
    k_par, k_ids, k_len = jax.random.split(key, 3)

    params = init_params(
        k_par, vocab_size=VOCAB, max_pos=MAX_POS, type_vocab=TYPE_VOCAB,
        hidden=HIDDEN, intermediate=INTER, num_layers=LAYERS,
        num_classes=CLASSES)
    stacked = stack_layers_for_kernel(params["layers"], HEADS)

    input_ids = jax.random.randint(k_ids, (B, S), 0, VOCAB, dtype=jnp.int32)
    lengths = jax.random.randint(k_len, (B, 1), 3, S + 1, dtype=jnp.int32)
    input_mask = (jnp.arange(S)[None, :] < lengths).astype(jnp.int32)   # [B, S]
    token_type_ids = jnp.zeros((B, S), dtype=jnp.int32)

    fwd = jax.jit(functools.partial(transformer_forward, num_heads=HEADS))
    preds, logits = fwd(params, stacked, input_ids, input_mask, token_type_ids)
    preds = jax.block_until_ready(preds)
    logits = jax.block_until_ready(logits)

    assert preds.shape == (B,)
    assert logits.shape == (B, CLASSES)
    assert bool(jnp.all(jnp.isfinite(logits)))
    print("KERNEL_OK")
</pallas_src>

<mosaic_0001>
module attributes {stable_mosaic.version = 11 : i64} {
  func.func @_encoder_kernel(%arg0: i32, %arg1: i32, %arg2: memref<1x8x32xf32, #tpu.memory_space<vmem>>, %arg3: memref<1x1x8xf32, #tpu.memory_space<vmem>>, %arg4: memref<1x32xf32, #tpu.memory_space<vmem>>, %arg5: memref<1x32xf32, #tpu.memory_space<vmem>>, %arg6: memref<1x32x96xbf16, #tpu.memory_space<vmem>>, %arg7: memref<1x1x96xf32, #tpu.memory_space<vmem>>, %arg8: memref<1x32x32xbf16, #tpu.memory_space<vmem>>, %arg9: memref<1x1x32xf32, #tpu.memory_space<vmem>>, %arg10: memref<1x1x32xf32, #tpu.memory_space<vmem>>, %arg11: memref<1x1x32xf32, #tpu.memory_space<vmem>>, %arg12: memref<1x32x64xbf16, #tpu.memory_space<vmem>>, %arg13: memref<1x1x64xf32, #tpu.memory_space<vmem>>, %arg14: memref<1x64x32xbf16, #tpu.memory_space<vmem>>, %arg15: memref<1x1x32xf32, #tpu.memory_space<vmem>>, %arg16: memref<1x1x32xf32, #tpu.memory_space<vmem>>, %arg17: memref<1x1x32xf32, #tpu.memory_space<vmem>>, %arg18: memref<1x8x32xbf16, #tpu.memory_space<vmem>>) attributes {dimension_semantics = [#tpu.dimension_semantics<parallel>, #tpu.dimension_semantics<arbitrary>], iteration_bounds = array<i64: 2, 2>, scalar_prefetch = 0 : i64, scratch_operands = 0 : i64, tpu.core_type = #tpu.core_type<tc>, window_params = [{transform_indices = @transform_0, window_bounds = array<i64: 1, 8, 32>}, {transform_indices = @transform_1, window_bounds = array<i64: 1, 1, 8>}, {pipeline_mode = #tpu.pipeline_mode<synchronous>, transform_indices = @transform_2, window_bounds = array<i64: 1, 32>}, {pipeline_mode = #tpu.pipeline_mode<synchronous>, transform_indices = @transform_3, window_bounds = array<i64: 1, 32>}, {transform_indices = @transform_4, window_bounds = array<i64: 1, 32, 96>}, {transform_indices = @transform_5, window_bounds = array<i64: 1, 1, 96>}, {transform_indices = @transform_6, window_bounds = array<i64: 1, 32, 32>}, {transform_indices = @transform_7, window_bounds = array<i64: 1, 1, 32>}, {transform_indices = @transform_8, window_bounds = array<i64: 1, 1, 32>}, {transform_indices = @transform_9, window_bounds = array<i64: 1, 1, 32>}, {transform_indices = @transform_10, window_bounds = array<i64: 1, 32, 64>}, {transform_indices = @transform_11, window_bounds = array<i64: 1, 1, 64>}, {transform_indices = @transform_12, window_bounds = array<i64: 1, 64, 32>}, {transform_indices = @transform_13, window_bounds = array<i64: 1, 1, 32>}, {transform_indices = @transform_14, window_bounds = array<i64: 1, 1, 32>}, {transform_indices = @transform_15, window_bounds = array<i64: 1, 1, 32>}, {transform_indices = @transform_16, window_bounds = array<i64: 1, 8, 32>}]} {
    %c0_i32 = arith.constant 0 : i32
    %0 = arith.cmpi eq, %arg1, %c0_i32 : i32
    %1 = arith.extui %0 : i1 to i32
    %c0_i32_0 = arith.constant 0 : i32
    %2 = arith.cmpi ne, %1, %c0_i32_0 : i32
    scf.if %2 {
      %c0_63 = arith.constant 0 : index
      %c0_64 = arith.constant 0 : index
      %c0_65 = arith.constant 0 : index
      %132 = vector.load %arg2[%c0_63, %c0_64, %c0_65] : memref<1x8x32xf32, #tpu.memory_space<vmem>>, vector<1x8x32xf32>
      %c0_66 = arith.constant 0 : index
      %c0_67 = arith.constant 0 : index
      %133 = vector.load %arg4[%c0_66, %c0_67] : memref<1x32xf32, #tpu.memory_space<vmem>>, vector<1x32xf32>
      %c0_68 = arith.constant 0 : index
      %c0_69 = arith.constant 0 : index
      %134 = vector.load %arg5[%c0_68, %c0_69] : memref<1x32xf32, #tpu.memory_space<vmem>>, vector<1x32xf32>
      %cst_70 = arith.constant dense<0.000000e+00> : vector<1x8xf32>
      %135 = vector.multi_reduction <add>, %132, %cst_70 [2] : vector<1x8x32xf32> to vector<1x8xf32>
      %136 = vector.shape_cast %135 : vector<1x8xf32> to vector<1x8x1xf32>
      %cst_71 = arith.constant 3.200000e+01 : f32
      %137 = vector.broadcast %cst_71 : f32 to vector<1x8x1xf32>
      %138 = arith.divf %136, %137 : vector<1x8x1xf32>
      %139 = vector.broadcast %138 : vector<1x8x1xf32> to vector<1x8x32xf32>
      %140 = arith.subf %132, %139 : vector<1x8x32xf32>
      %141 = arith.mulf %140, %140 : vector<1x8x32xf32>
      %cst_72 = arith.constant dense<0.000000e+00> : vector<1x8xf32>
      %142 = vector.multi_reduction <add>, %141, %cst_72 [2] : vector<1x8x32xf32> to vector<1x8xf32>
      %143 = vector.shape_cast %142 : vector<1x8xf32> to vector<1x8x1xf32>
      %cst_73 = arith.constant 3.200000e+01 : f32
      %144 = vector.broadcast %cst_73 : f32 to vector<1x8x1xf32>
      %145 = arith.divf %143, %144 : vector<1x8x1xf32>
      %146 = vector.broadcast %138 : vector<1x8x1xf32> to vector<1x8x32xf32>
      %147 = arith.subf %132, %146 : vector<1x8x32xf32>
      %cst_74 = arith.constant 9.99999996E-13 : f32
      %148 = vector.broadcast %cst_74 : f32 to vector<1x8x1xf32>
      %149 = arith.addf %145, %148 : vector<1x8x1xf32>
      %150 = math.rsqrt %149 : vector<1x8x1xf32>
      %151 = vector.broadcast %150 : vector<1x8x1xf32> to vector<1x8x32xf32>
      %152 = arith.mulf %147, %151 : vector<1x8x32xf32>
      %153 = vector.shape_cast %133 : vector<1x32xf32> to vector<1x1x32xf32>
      %154 = vector.broadcast %153 : vector<1x1x32xf32> to vector<1x8x32xf32>
      %155 = arith.mulf %152, %154 : vector<1x8x32xf32>
      %156 = vector.shape_cast %134 : vector<1x32xf32> to vector<1x1x32xf32>
      %157 = vector.broadcast %156 : vector<1x1x32xf32> to vector<1x8x32xf32>
      %158 = arith.addf %155, %157 : vector<1x8x32xf32>
      %159 = arith.truncf %158 : vector<1x8x32xf32> to vector<1x8x32xbf16>
      %c0_75 = arith.constant 0 : index
      %c0_76 = arith.constant 0 : index
      %c0_77 = arith.constant 0 : index
      %160 = vector.load %arg18[%c0_75, %c0_76, %c0_77] : memref<1x8x32xbf16, #tpu.memory_space<vmem>>, vector<1x8x32xbf16>
      tpu.vector_store %arg18[%c0_75, %c0_76, %c0_77], %159 {strides = array<i32>} : memref<1x8x32xbf16, #tpu.memory_space<vmem>>, vector<1x8x32xbf16>,
    } else {
    }
    %c0 = arith.constant 0 : index
    %c0_1 = arith.constant 0 : index
    %c0_2 = arith.constant 0 : index
    %3 = vector.load %arg18[%c0, %c0_1, %c0_2] : memref<1x8x32xbf16, #tpu.memory_space<vmem>>, vector<1x8x32xbf16>
    %4 = arith.extf %3 : vector<1x8x32xbf16> to vector<1x8x32xf32>
    %5 = vector.shape_cast %4 : vector<1x8x32xf32> to vector<8x32xf32>
    %6 = arith.truncf %5 : vector<8x32xf32> to vector<8x32xbf16>
    %c0_3 = arith.constant 0 : index
    %c0_4 = arith.constant 0 : index
    %c0_5 = arith.constant 0 : index
    %7 = vector.load %arg6[%c0_3, %c0_4, %c0_5] : memref<1x32x96xbf16, #tpu.memory_space<vmem>>, vector<1x32x96xbf16>
    %8 = vector.shape_cast %7 : vector<1x32x96xbf16> to vector<32x96xbf16>
    %cst = arith.constant dense<0.000000e+00> : vector<8x96xf32>
    %9 = tpu.matmul %6, %8, %cst {dimension_numbers = #tpu.dot_dimension_numbers<[1], [0], [0], [1], [0, 0, 1, 1], [], []>} : vector<8x32xbf16>, vector<32x96xbf16>, vector<8x96xf32> -> vector<8x96xf32>
    %c0_6 = arith.constant 0 : index
    %c0_7 = arith.constant 0 : index
    %c0_8 = arith.constant 0 : index
    %10 = vector.load %arg7[%c0_6, %c0_7, %c0_8] : memref<1x1x96xf32, #tpu.memory_space<vmem>>, vector<1x1x96xf32>
    %11 = vector.shape_cast %10 : vector<1x1x96xf32> to vector<1x96xf32>
    %12 = vector.broadcast %11 : vector<1x96xf32> to vector<8x96xf32>
    %13 = arith.addf %9, %12 : vector<8x96xf32>
    %14 = vector.extract_strided_slice %13 {offsets = [0, 0], sizes = [8, 32], strides = [1, 1]} : vector<8x96xf32> to vector<8x32xf32>
    %15 = vector.shape_cast %14 : vector<8x32xf32> to vector<1x8x4x8xf32>
    %16 = vector.extract_strided_slice %13 {offsets = [0, 32], sizes = [8, 32], strides = [1, 1]} : vector<8x96xf32> to vector<8x32xf32>
    %17 = vector.shape_cast %16 : vector<8x32xf32> to vector<1x8x4x8xf32>
    %18 = vector.extract_strided_slice %13 {offsets = [0, 64], sizes = [8, 32], strides = [1, 1]} : vector<8x96xf32> to vector<8x32xf32>
    %19 = vector.shape_cast %18 : vector<8x32xf32> to vector<1x8x4x8xf32>
    %c0_9 = arith.constant 0 : index
    %c0_10 = arith.constant 0 : index
    %c0_11 = arith.constant 0 : index
    %20 = vector.load %arg3[%c0_9, %c0_10, %c0_11] : memref<1x1x8xf32, #tpu.memory_space<vmem>>, vector<1x1x8xf32>
    %21 = vector.shape_cast %15 : vector<1x8x4x8xf32> to vector<8x4x8xf32>
    %22 = arith.truncf %21 : vector<8x4x8xf32> to vector<8x4x8xbf16>
    %23 = tpu.transpose %22, [1, 0, 2] : vector<8x4x8xbf16> -> vector<4x8x8xbf16>
    %24 = vector.shape_cast %17 : vector<1x8x4x8xf32> to vector<8x4x8xf32>
    %25 = arith.truncf %24 : vector<8x4x8xf32> to vector<8x4x8xbf16>
    %26 = tpu.transpose %25, [1, 0, 2] : vector<8x4x8xbf16> -> vector<4x8x8xbf16>
    %27 = vector.shape_cast %19 : vector<1x8x4x8xf32> to vector<8x4x8xf32>
    %28 = arith.truncf %27 : vector<8x4x8xf32> to vector<8x4x8xbf16>
    %29 = tpu.transpose %28, [1, 0, 2] : vector<8x4x8xbf16> -> vector<4x8x8xbf16>
    "tpu.trace_start"() <{level = 10 : i32, message = "nqd,nkd->nqk"}> : () -> ()
    %cst_12 = arith.constant dense<0.000000e+00> : vector<4x8x8xf32>
    %30 = tpu.matmul %23, %26, %cst_12 {dimension_numbers = #tpu.dot_dimension_numbers<[2], [2], [1], [1], [0, 0, 0, 1, 1, 1], [0], [0]>} : vector<4x8x8xbf16>, vector<4x8x8xbf16>, vector<4x8x8xf32> -> vector<4x8x8xf32>
    "tpu.trace_stop"() : () -> ()
    %31 = vector.shape_cast %20 : vector<1x1x8xf32> to vector<1x8xf32>
    %32 = vector.shape_cast %31 : vector<1x8xf32> to vector<1x1x8xf32>
    %33 = vector.broadcast %32 : vector<1x1x8xf32> to vector<4x8x8xf32>
    %34 = arith.addf %30, %33 : vector<4x8x8xf32>
    %cst_13 = arith.constant dense<0xFF800000> : vector<4x8xf32>
    %35 = vector.multi_reduction <maximumf>, %34, %cst_13 [2] : vector<4x8x8xf32> to vector<4x8xf32>
    %36 = vector.shape_cast %35 : vector<4x8xf32> to vector<4x8x1xf32>
    %37 = vector.broadcast %36 : vector<4x8x1xf32> to vector<4x8x8xf32>
    %38 = arith.subf %34, %37 : vector<4x8x8xf32>
    %39 = math.exp %38 : vector<4x8x8xf32>
    %cst_14 = arith.constant dense<0.000000e+00> : vector<4x8xf32>
    %40 = vector.multi_reduction <add>, %39, %cst_14 [2] : vector<4x8x8xf32> to vector<4x8xf32>
    %41 = vector.shape_cast %40 : vector<4x8xf32> to vector<4x8x1xf32>
    %42 = tpu.reciprocal %41 : vector<4x8x1xf32> -> vector<4x8x1xf32>
    %43 = vector.broadcast %42 : vector<4x8x1xf32> to vector<4x8x8xf32>
    %44 = arith.mulf %39, %43 : vector<4x8x8xf32>
    %45 = arith.truncf %44 : vector<4x8x8xf32> to vector<4x8x8xbf16>
    "tpu.trace_start"() <{level = 10 : i32, message = "nqk,nkd->nqd"}> : () -> ()
    %cst_15 = arith.constant dense<0.000000e+00> : vector<4x8x8xf32>
    %46 = tpu.matmul %45, %29, %cst_15 {dimension_numbers = #tpu.dot_dimension_numbers<[2], [1], [1], [2], [0, 0, 0, 1, 1, 2], [0], [0]>} : vector<4x8x8xbf16>, vector<4x8x8xbf16>, vector<4x8x8xf32> -> vector<4x8x8xf32>
    "tpu.trace_stop"() : () -> ()
    %47 = tpu.transpose %46, [1, 0, 2] : vector<4x8x8xf32> -> vector<8x4x8xf32>
    %48 = vector.shape_cast %47 : vector<8x4x8xf32> to vector<8x32xf32>
    %49 = arith.truncf %48 : vector<8x32xf32> to vector<8x32xbf16>
    %c0_16 = arith.constant 0 : index
    %c0_17 = arith.constant 0 : index
    %c0_18 = arith.constant 0 : index
    %50 = vector.load %arg8[%c0_16, %c0_17, %c0_18] : memref<1x32x32xbf16, #tpu.memory_space<vmem>>, vector<1x32x32xbf16>
    %51 = vector.shape_cast %50 : vector<1x32x32xbf16> to vector<32x32xbf16>
    %cst_19 = arith.constant dense<0.000000e+00> : vector<8x32xf32>
    %52 = tpu.matmul %49, %51, %cst_19 {dimension_numbers = #tpu.dot_dimension_numbers<[1], [0], [0], [1], [0, 0, 1, 1], [], []>} : vector<8x32xbf16>, vector<32x32xbf16>, vector<8x32xf32> -> vector<8x32xf32>
    %c0_20 = arith.constant 0 : index
    %c0_21 = arith.constant 0 : index
    %c0_22 = arith.constant 0 : index
    %53 = vector.load %arg9[%c0_20, %c0_21, %c0_22] : memref<1x1x32xf32, #tpu.memory_space<vmem>>, vector<1x1x32xf32>
    %54 = vector.shape_cast %53 : vector<1x1x32xf32> to vector<1x32xf32>
    %55 = vector.broadcast %54 : vector<1x32xf32> to vector<8x32xf32>
    %56 = arith.addf %52, %55 : vector<8x32xf32>
    %57 = arith.addf %56, %5 : vector<8x32xf32>
    %c0_23 = arith.constant 0 : index
    %c0_24 = arith.constant 0 : index
    %c0_25 = arith.constant 0 : index
    %58 = vector.load %arg10[%c0_23, %c0_24, %c0_25] : memref<1x1x32xf32, #tpu.memory_space<vmem>>, vector<1x1x32xf32>
    %59 = vector.shape_cast %58 : vector<1x1x32xf32> to vector<1x32xf32>
    %c0_26 = arith.constant 0 : index
    %c0_27 = arith.constant 0 : index
    %c0_28 = arith.constant 0 : index
    %60 = vector.load %arg11[%c0_26, %c0_27, %c0_28] : memref<1x1x32xf32, #tpu.memory_space<vmem>>, vector<1x1x32xf32>
    %61 = vector.shape_cast %60 : vector<1x1x32xf32> to vector<1x32xf32>
    %cst_29 = arith.constant dense<0.000000e+00> : vector<8xf32>
    %62 = vector.multi_reduction <add>, %57, %cst_29 [1] : vector<8x32xf32> to vector<8xf32>
    %63 = vector.shape_cast %62 : vector<8xf32> to vector<8x1xf32>
    %cst_30 = arith.constant 3.200000e+01 : f32
    %64 = vector.broadcast %cst_30 : f32 to vector<8x1xf32>
    %65 = arith.divf %63, %64 : vector<8x1xf32>
    %66 = vector.broadcast %65 : vector<8x1xf32> to vector<8x32xf32>
    %67 = arith.subf %57, %66 : vector<8x32xf32>
    %68 = arith.mulf %67, %67 : vector<8x32xf32>
    %cst_31 = arith.constant dense<0.000000e+00> : vector<8xf32>
    %69 = vector.multi_reduction <add>, %68, %cst_31 [1] : vector<8x32xf32> to vector<8xf32>
    %70 = vector.shape_cast %69 : vector<8xf32> to vector<8x1xf32>
    %cst_32 = arith.constant 3.200000e+01 : f32
    %71 = vector.broadcast %cst_32 : f32 to vector<8x1xf32>
    %72 = arith.divf %70, %71 : vector<8x1xf32>
    %73 = vector.broadcast %65 : vector<8x1xf32> to vector<8x32xf32>
    %74 = arith.subf %57, %73 : vector<8x32xf32>
    %cst_33 = arith.constant 9.99999996E-13 : f32
    %75 = vector.broadcast %cst_33 : f32 to vector<8x1xf32>
    %76 = arith.addf %72, %75 : vector<8x1xf32>
    %77 = math.rsqrt %76 : vector<8x1xf32>
    %78 = vector.broadcast %77 : vector<8x1xf32> to vector<8x32xf32>
    %79 = arith.mulf %74, %78 : vector<8x32xf32>
    %80 = vector.broadcast %59 : vector<1x32xf32> to vector<8x32xf32>
    %81 = arith.mulf %79, %80 : vector<8x32xf32>
    %82 = vector.broadcast %61 : vector<1x32xf32> to vector<8x32xf32>
    %83 = arith.addf %81, %82 : vector<8x32xf32>
    %84 = arith.truncf %83 : vector<8x32xf32> to vector<8x32xbf16>
    %c0_34 = arith.constant 0 : index
    %c0_35 = arith.constant 0 : index
    %c0_36 = arith.constant 0 : index
    %85 = vector.load %arg12[%c0_34, %c0_35, %c0_36] : memref<1x32x64xbf16, #tpu.memory_space<vmem>>, vector<1x32x64xbf16>
    %86 = vector.shape_cast %85 : vector<1x32x64xbf16> to vector<32x64xbf16>
    %cst_37 = arith.constant dense<0.000000e+00> : vector<8x64xf32>
    %87 = tpu.matmul %84, %86, %cst_37 {dimension_numbers = #tpu.dot_dimension_numbers<[1], [0], [0], [1], [0, 0, 1, 1], [], []>} : vector<8x32xbf16>, vector<32x64xbf16>, vector<8x64xf32> -> vector<8x64xf32>
    %c0_38 = arith.constant 0 : index
    %c0_39 = arith.constant 0 : index
    %c0_40 = arith.constant 0 : index
    %88 = vector.load %arg13[%c0_38, %c0_39, %c0_40] : memref<1x1x64xf32, #tpu.memory_space<vmem>>, vector<1x1x64xf32>
    %89 = vector.shape_cast %88 : vector<1x1x64xf32> to vector<1x64xf32>
    %90 = vector.broadcast %89 : vector<1x64xf32> to vector<8x64xf32>
    %91 = arith.addf %87, %90 : vector<8x64xf32>
    %cst_41 = arith.constant 0.000000e+00 : f32
    %92 = vector.broadcast %cst_41 : f32 to vector<8x64xf32>
    %93 = arith.maximumf %91, %92 : vector<8x64xf32>
    %94 = arith.truncf %93 : vector<8x64xf32> to vector<8x64xbf16>
    %c0_42 = arith.constant 0 : index
    %c0_43 = arith.constant 0 : index
    %c0_44 = arith.constant 0 : index
    %95 = vector.load %arg14[%c0_42, %c0_43, %c0_44] : memref<1x64x32xbf16, #tpu.memory_space<vmem>>, vector<1x64x32xbf16>
    %96 = vector.shape_cast %95 : vector<1x64x32xbf16> to vector<64x32xbf16>
    %cst_45 = arith.constant dense<0.000000e+00> : vector<8x32xf32>
    %97 = tpu.matmul %94, %96, %cst_45 {dimension_numbers = #tpu.dot_dimension_numbers<[1], [0], [0], [1], [0, 0, 1, 1], [], []>} : vector<8x64xbf16>, vector<64x32xbf16>, vector<8x32xf32> -> vector<8x32xf32>
    %c0_46 = arith.constant 0 : index
    %c0_47 = arith.constant 0 : index
    %c0_48 = arith.constant 0 : index
    %98 = vector.load %arg15[%c0_46, %c0_47, %c0_48] : memref<1x1x32xf32, #tpu.memory_space<vmem>>, vector<1x1x32xf32>
    %99 = vector.shape_cast %98 : vector<1x1x32xf32> to vector<1x32xf32>
    %100 = vector.broadcast %99 : vector<1x32xf32> to vector<8x32xf32>
    %101 = arith.addf %97, %100 : vector<8x32xf32>
    %102 = arith.addf %101, %83 : vector<8x32xf32>
    %c0_49 = arith.constant 0 : index
    %c0_50 = arith.constant 0 : index
    %c0_51 = arith.constant 0 : index
    %103 = vector.load %arg16[%c0_49, %c0_50, %c0_51] : memref<1x1x32xf32, #tpu.memory_space<vmem>>, vector<1x1x32xf32>
    %104 = vector.shape_cast %103 : vector<1x1x32xf32> to vector<1x32xf32>
    %c0_52 = arith.constant 0 : index
    %c0_53 = arith.constant 0 : index
    %c0_54 = arith.constant 0 : index
    %105 = vector.load %arg17[%c0_52, %c0_53, %c0_54] : memref<1x1x32xf32, #tpu.memory_space<vmem>>, vector<1x1x32xf32>
    %106 = vector.shape_cast %105 : vector<1x1x32xf32> to vector<1x32xf32>
    %cst_55 = arith.constant dense<0.000000e+00> : vector<8xf32>
    %107 = vector.multi_reduction <add>, %102, %cst_55 [1] : vector<8x32xf32> to vector<8xf32>
    %108 = vector.shape_cast %107 : vector<8xf32> to vector<8x1xf32>
    %cst_56 = arith.constant 3.200000e+01 : f32
    %109 = vector.broadcast %cst_56 : f32 to vector<8x1xf32>
    %110 = arith.divf %108, %109 : vector<8x1xf32>
    %111 = vector.broadcast %110 : vector<8x1xf32> to vector<8x32xf32>
    %112 = arith.subf %102, %111 : vector<8x32xf32>
    %113 = arith.mulf %112, %112 : vector<8x32xf32>
    %cst_57 = arith.constant dense<0.000000e+00> : vector<8xf32>
    %114 = vector.multi_reduction <add>, %113, %cst_57 [1] : vector<8x32xf32> to vector<8xf32>
    %115 = vector.shape_cast %114 : vector<8xf32> to vector<8x1xf32>
    %cst_58 = arith.constant 3.200000e+01 : f32
    %116 = vector.broadcast %cst_58 : f32 to vector<8x1xf32>
    %117 = arith.divf %115, %116 : vector<8x1xf32>
    %118 = vector.broadcast %110 : vector<8x1xf32> to vector<8x32xf32>
    %119 = arith.subf %102, %118 : vector<8x32xf32>
    %cst_59 = arith.constant 9.99999996E-13 : f32
    %120 = vector.broadcast %cst_59 : f32 to vector<8x1xf32>
    %121 = arith.addf %117, %120 : vector<8x1xf32>
    %122 = math.rsqrt %121 : vector<8x1xf32>
    %123 = vector.broadcast %122 : vector<8x1xf32> to vector<8x32xf32>
    %124 = arith.mulf %119, %123 : vector<8x32xf32>
    %125 = vector.broadcast %104 : vector<1x32xf32> to vector<8x32xf32>
    %126 = arith.mulf %124, %125 : vector<8x32xf32>
    %127 = vector.broadcast %106 : vector<1x32xf32> to vector<8x32xf32>
    %128 = arith.addf %126, %127 : vector<8x32xf32>
    %129 = vector.shape_cast %128 : vector<8x32xf32> to vector<1x8x32xf32>
    %130 = arith.truncf %129 : vector<1x8x32xf32> to vector<1x8x32xbf16>
    %c0_60 = arith.constant 0 : index
    %c0_61 = arith.constant 0 : index
    %c0_62 = arith.constant 0 : index
    %131 = vector.load %arg18[%c0_60, %c0_61, %c0_62] : memref<1x8x32xbf16, #tpu.memory_space<vmem>>, vector<1x8x32xbf16>
    tpu.vector_store %arg18[%c0_60, %c0_61, %c0_62], %130 {strides = array<i32>} : memref<1x8x32xbf16, #tpu.memory_space<vmem>>, vector<1x8x32xbf16>,
    return
  }
  func.func @transform_0(%arg0: i32, %arg1: i32) -> (i32, i32, i32) {
    %c0_i32 = arith.constant 0 : i32
    %c0_i32_0 = arith.constant 0 : i32
    %c0_i32_1 = arith.constant 0 : i32
    return %arg0, %c0_i32, %c0_i32_0 : i32, i32, i32
  }
  func.func @transform_1(%arg0: i32, %arg1: i32) -> (i32, i32, i32) {
    %c0_i32 = arith.constant 0 : i32
    %c0_i32_0 = arith.constant 0 : i32
    %c0_i32_1 = arith.constant 0 : i32
    return %arg0, %c0_i32, %c0_i32_0 : i32, i32, i32
  }
  func.func @transform_2(%arg0: i32, %arg1: i32) -> (i32, i32) {
    %c0_i32 = arith.constant 0 : i32
    %c0_i32_0 = arith.constant 0 : i32
    %c0_i32_1 = arith.constant 0 : i32
    return %c0_i32, %c0_i32_0 : i32, i32
  }
  func.func @transform_3(%arg0: i32, %arg1: i32) -> (i32, i32) {
    %c0_i32 = arith.constant 0 : i32
    %c0_i32_0 = arith.constant 0 : i32
    %c0_i32_1 = arith.constant 0 : i32
    return %c0_i32, %c0_i32_0 : i32, i32
  }
  func.func @transform_4(%arg0: i32, %arg1: i32) -> (i32, i32, i32) {
    %c0_i32 = arith.constant 0 : i32
    %c0_i32_0 = arith.constant 0 : i32
    %c0_i32_1 = arith.constant 0 : i32
    return %arg1, %c0_i32, %c0_i32_0 : i32, i32, i32
  }
  func.func @transform_5(%arg0: i32, %arg1: i32) -> (i32, i32, i32) {
    %c0_i32 = arith.constant 0 : i32
    %c0_i32_0 = arith.constant 0 : i32
    %c0_i32_1 = arith.constant 0 : i32
    return %arg1, %c0_i32, %c0_i32_0 : i32, i32, i32
  }
  func.func @transform_6(%arg0: i32, %arg1: i32) -> (i32, i32, i32) {
    %c0_i32 = arith.constant 0 : i32
    %c0_i32_0 = arith.constant 0 : i32
    %c0_i32_1 = arith.constant 0 : i32
    return %arg1, %c0_i32, %c0_i32_0 : i32, i32, i32
  }
  func.func @transform_7(%arg0: i32, %arg1: i32) -> (i32, i32, i32) {
    %c0_i32 = arith.constant 0 : i32
    %c0_i32_0 = arith.constant 0 : i32
    %c0_i32_1 = arith.constant 0 : i32
    return %arg1, %c0_i32, %c0_i32_0 : i32, i32, i32
  }
  func.func @transform_8(%arg0: i32, %arg1: i32) -> (i32, i32, i32) {
    %c0_i32 = arith.constant 0 : i32
    %c0_i32_0 = arith.constant 0 : i32
    %c0_i32_1 = arith.constant 0 : i32
    return %arg1, %c0_i32, %c0_i32_0 : i32, i32, i32
  }
  func.func @transform_9(%arg0: i32, %arg1: i32) -> (i32, i32, i32) {
    %c0_i32 = arith.constant 0 : i32
    %c0_i32_0 = arith.constant 0 : i32
    %c0_i32_1 = arith.constant 0 : i32
    return %arg1, %c0_i32, %c0_i32_0 : i32, i32, i32
  }
  func.func @transform_10(%arg0: i32, %arg1: i32) -> (i32, i32, i32) {
    %c0_i32 = arith.constant 0 : i32
    %c0_i32_0 = arith.constant 0 : i32
    %c0_i32_1 = arith.constant 0 : i32
    return %arg1, %c0_i32, %c0_i32_0 : i32, i32, i32
  }
  func.func @transform_11(%arg0: i32, %arg1: i32) -> (i32, i32, i32) {
    %c0_i32 = arith.constant 0 : i32
    %c0_i32_0 = arith.constant 0 : i32
    %c0_i32_1 = arith.constant 0 : i32
    return %arg1, %c0_i32, %c0_i32_0 : i32, i32, i32
  }
  func.func @transform_12(%arg0: i32, %arg1: i32) -> (i32, i32, i32) {
    %c0_i32 = arith.constant 0 : i32
    %c0_i32_0 = arith.constant 0 : i32
    %c0_i32_1 = arith.constant 0 : i32
    return %arg1, %c0_i32, %c0_i32_0 : i32, i32, i32
  }
  func.func @transform_13(%arg0: i32, %arg1: i32) -> (i32, i32, i32) {
    %c0_i32 = arith.constant 0 : i32
    %c0_i32_0 = arith.constant 0 : i32
    %c0_i32_1 = arith.constant 0 : i32
    return %arg1, %c0_i32, %c0_i32_0 : i32, i32, i32
  }
  func.func @transform_14(%arg0: i32, %arg1: i32) -> (i32, i32, i32) {
    %c0_i32 = arith.constant 0 : i32
    %c0_i32_0 = arith.constant 0 : i32
    %c0_i32_1 = arith.constant 0 : i32
    return %arg1, %c0_i32, %c0_i32_0 : i32, i32, i32
  }
  func.func @transform_15(%arg0: i32, %arg1: i32) -> (i32, i32, i32) {
    %c0_i32 = arith.constant 0 : i32
    %c0_i32_0 = arith.constant 0 : i32
    %c0_i32_1 = arith.constant 0 : i32
    return %arg1, %c0_i32, %c0_i32_0 : i32, i32, i32
  }
  func.func @transform_16(%arg0: i32, %arg1: i32) -> (i32, i32, i32) {
    %c0_i32 = arith.constant 0 : i32
    %c0_i32_0 = arith.constant 0 : i32
    %c0_i32_1 = arith.constant 0 : i32
    return %arg0, %c0_i32, %c0_i32_0 : i32, i32, i32
  }
}

</mosaic_0001>

<bundles_post_ra>
// kernel: transformer_forward.1
= control target key start
LH: loop header
LB: loop body
LE: loop exit
PB: predicated region body
PF: predicated region fallthrough
CT: control target
= control target key end

     0   :  { %s2755_s21 = smov 0   ;;  %s2757_s22 = smov 0   ;;  %s3143_s0 = inlined_call_operand.vmem [shape: f32[2,8,32], index: 0, kind: input, shape index: {}]   ;;  %s3144_s1 = inlined_call_operand.vmem [shape: f32[2,1,8], index: 1, kind: input, shape index: {}]   ;;  %s3145_s2 = inlined_call_operand.vmem [shape: f32[1,32], index: 2, kind: input, shape index: {}]   ;;  %s3146_s3 = inlined_call_operand.vmem [shape: f32[1,32], index: 3, kind: input, shape index: {}]   ;;  %s3147_s4 = inlined_call_operand.vmem [shape: bf16[2,32,96], index: 4, kind: input, shape index: {}]   ;;  %s3148_s5 = inlined_call_operand.vmem [shape: f32[2,1,96], index: 5, kind: input, shape index: {}]   ;;  %s3149_s6 = inlined_call_operand.vmem [shape: bf16[2,32,32], index: 6, kind: input, shape index: {}]   ;;  %s3150_s7 = inlined_call_operand.vmem [shape: f32[2,1,32], index: 7, kind: input, shape index: {}]   ;;  %s3151_s8 = inlined_call_operand.vmem [shape: f32[2,1,32], index: 8, kind: input, shape index: {}]   ;;  %s3152_s9 = inlined_call_operand.vmem [shape: f32[2,1,32], index: 9, kind: input, shape index: {}]   ;;  %s3153_s10 = inlined_call_operand.vmem [shape: bf16[2,32,64], index: 10, kind: input, shape index: {}]   ;;  %s3154_s11 = inlined_call_operand.vmem [shape: f32[2,1,64], index: 11, kind: input, shape index: {}]   ;;  %s3155_s12 = inlined_call_operand.vmem [shape: bf16[2,64,32], index: 12, kind: input, shape index: {}]   ;;  %s3156_s13 = inlined_call_operand.vmem [shape: f32[2,1,32], index: 13, kind: input, shape index: {}]   ;;  %s3157_s14 = inlined_call_operand.vmem [shape: f32[2,1,32], index: 14, kind: input, shape index: {}]   ;;  %s3158_s15 = inlined_call_operand.vmem [shape: f32[2,1,32], index: 15, kind: input, shape index: {}]   ;;  %s3159_s16 = inlined_call_operand.vmem [shape: bf16[2,8,32], index: 16, kind: output, shape index: {}]  }
   0x1   :  { %3164 = sst [smem:[#allocation8_spill]] %s3143_s0  ;;  %s2759_s23 = smov 0  }
   0x2   :  { %3165 = sst [smem:[#allocation9_spill]] %s3144_s1  ;;  %s2761_s24 = smov 0  }
   0x3   :  { %3166 = sst [smem:[#allocation10_spill]] %s3145_s2  ;;  %s2763_s25 = smov 0  }
   0x4   :  { %3167 = sst [smem:[#allocation11_spill]] %s3146_s3 }
   0x5   :  { %3168 = sst [smem:[#allocation12_spill]] %s3147_s4 }
   0x6   :  { %3169 = sst [smem:[#allocation13_spill]] %s3149_s6 }
   0x7   :  { %3170 = sst [smem:[#allocation14_spill]] %s3152_s9 }
   0x8   :  { %3171 = sst [smem:[#allocation15_spill]] %s3153_s10 }
   0x9   :  { %3172 = sst [smem:[#allocation16_spill]] %s3154_s11 }
   0xa   :  { %3173 = sst [smem:[#allocation17_spill]] %s3158_s15 }
   0xb   :  { %3174 = sst [smem:[#allocation18_spill]] %s3159_s16 }
   0xc LB: > { %3175 = sst [smem:[#allocation2_spill]] %s2639_s21  ;;  %s35_s26 = sadd.s32 1, %s2647_s23  ;;  %s2655_s25 = sphi %s2763_s25, %s26_s25   ;;  %s2651_s24 = sphi %s2761_s24, %s3207_s24   ;;  %s2647_s23 = sphi %s2759_s23, %s3206_s23   ;;  %s2643_s22 = sphi %s2757_s22, %s3205_s22   ;;  %s2639_s21 = sphi %s2755_s21, %s3204_s21  }
   0xd   : > { %3176 = sst [smem:[#allocation3_spill]] %s2647_s23  ;;  %s38_s27 = sadd.s32 1, %s2651_s24 }
   0xe   : > { %3177 = sst [smem:[#allocation4_spill]] %s2651_s24  ;;  %p36_p0 = scmp.ge.s32.totalorder %s35_s26, 2 }
   0xf   : > { %3178 = sst [smem:[#allocation5_spill]] %s2655_s25  ;;  %p2351_p1 = scmp.ge.s32.totalorder %s2655_s25, 1 }
  0x10   : > { %p585_p2 = scmp.lt.s32.totalorder %s2655_s25, 5  ;;  %s3209_s26 = smov (%p36_p0, %s35_s26), 0 }
  0x11   : > { %3179 = sst [smem:[#allocation6_spill]] %s3209_s26  ;;  %s3211_s27 = smov (!%p36_p0, %s38_s27), %s2651_s24 }
  0x12   : > { %p586_p3 = pnand %p2351_p1, %p585_p2  ;;  %p40_p4 = scmp.ge.s32.totalorder %s3211_s27, 2 }
  0x13   : > { %p680_p5 = scmp.lt.s32.totalorder (!%p586_p3), %s2643_s22, 1  ;;  %p687_p6 = scmp.lt.s32.totalorder (!%p586_p3), %s2639_s21, 1 }
  0x14   : > { %s3213_s27 = smov (%p40_p4, %s3211_s27), 0  ;;  %589 = sbr.rel (%p586_p3) target bundleno = 2936 (0xb78), region = 84 }
  0x15   : > { %3180 = sst [smem:[#allocation7_spill]] %s3213_s27 }
  0x16   : > { %s3182_s20 = sld [smem:[#allocation8_spill]] (!%p586_p3) }
  0x17   : > { %s3183_s4 = sld [smem:[#allocation12_spill]] (!%p586_p3) }
  0x18   : > { %s3184_s6 = sld [smem:[#allocation13_spill]] (!%p586_p3) }
  0x19   : > { %s3215_s22 = smov (!%p680_p5, %s2643_s22), 1  ;;  %s3186_s10 = sld [smem:[#allocation15_spill]] }
  0x1a   : > { %s2791_s28 = scalar_select %p687_p6, %s2639_s21, 1 }
  0x1b   : > { %s2352_s29 = sshll.u32 %s3215_s22, 3  ;;  %s2361_s15 = sshll.u32 %s3215_s22, 2 }
  0x1c   : > { %s683_s27 = scalar_lea.vmem %s3182_s20, %s2352_s29  ;;  %s2413_s26 = sshll.u32 %s2791_s28, 4 }
  0x1d   : > { %s2805_s25 = scalar_lea.vmem %s3183_s4, %s2413_s26  ;;  %s724_s18 = scalar_lea.vmem %s3156_s13, %s2791_s28 }
  0x1e   : > { %s2814_s30 = scalar_lea.vmem %s3184_s6, %s2413_s26  ;;  %s2416_s6 = sshll.u32 %s2791_s28, 5 }
  0x1f   : > { %s2831_s3 = scalar_lea.vmem %s3186_s10, %s2413_s26  ;;  %s2845_s20 = scalar_lea.vmem %s3155_s12, %s2416_s6 }
  0x20   : > { %s727_s1 = scalar_lea.vmem %s3157_s14, %s2791_s28  ;;  %s3188_s4 = sld [smem:[#allocation17_spill]] }
  0x21   : > { %s3189_s11 = sld [smem:[#allocation18_spill]] }
  0x22   : > { %s3190_s17 = sld [smem:[#allocation2_spill]] }
  0x26   : > { %s730_s10 = scalar_lea.vmem %s3188_s4, %s2791_s28 }
  0x27   : > { %s2859_s9 = scalar_lea.vmem %s3189_s11, %s2361_s15 }
  0x28   : > { %p2362_p7 = scmp.ne.s32.totalorder %s3190_s17, 0 }
  0x29   : > { %s3191_s11 = sld [smem:[#allocation10_spill]] (!%p2362_p7) }
  0x2a   : > { %739 = sbr.rel (%p2362_p7) target bundleno = 359 (0x167), region = 88  ;;  %s3192_s0 = sld [smem:[#allocation11_spill]] (!%p2362_p7) }
  0x2f   : > { %v740_v0 = vld [vmem:[%s683_s27] sm:$0xff]  ;;  %vm743_vm0 = vcmask 261120   ;;  %vm773_vm1 = vcmask 257024  }
  0x30   : > { %v744_v1 = vsel %vm743_vm0, %v740_v0, 0.0  ;;  %v2363_v11 = vld [vmem:[%s3191_s11] ss:$0 sm:$0xff] }
  0x31   : > { %745 = vadd.xlane.f32.xlu0 %v744_v1  ;;  %v2364_v13 = vld [vmem:[%s3192_s0] ss:$0 sm:$0xff] }
  0xba   : > { %v746_v2 = vpop.xlane.xlu0 %745 }
  0xbb   : > { %v748_v3 = vmul.f32 0.03125, %v746_v2 }
  0xbd   : > { %v749_v4 = vsub.f32 %v740_v0, %v748_v3 }
  0xbf   : > { %v750_v5 = vmul.f32 %v749_v4, %v749_v4 }
  0xc1   : > { %v751_v6 = vsel %vm743_vm0, %v750_v5, 0.0 }
  0xc2   : > { %752 = vadd.xlane.f32.xlu0 %v751_v6 }
 0x14b   : > { %v753_v7 = vpop.xlane.xlu0 %752 }
 0x14c   : > { %v754_v8 = vmul.f32 0.03125, %v753_v7 }
 0x14e   : > { %v755_v9 = vadd.f32 1e-12, %v754_v8 }
 0x150   : > { %2584 = vrsqrt.f32 %v755_v9 }
 0x15d   : > { %v2585_v10 = vpop.eup %2584 }
 0x15e   : > { %v757_v12 = vmul.f32 %v2585_v10, %v749_v4 }
 0x160   : > { %v764_v14 = vmul.f32 %v2363_v11, %v757_v12 }
 0x162   : > { %v771_v15 = vadd.f32 %v2364_v13, %v764_v14 }
 0x164   : > { %v772_v16 = vpack.c.bf16 %v771_v15, %v771_v15 }
 0x166   : > { %774 = vst.msk [vmem:[%s2859_s9] sm:$0xf] %vm773_vm1, %v772_v16 }
 0x167 PF: > { %v2586_v17 = vld [vmem:[%s2805_s25 + $0x8] sm:$0xff]   ;;  %v2657_v18 = vmov 0.0   ;;  %v2587_v19 = vld [vmem:[%s2805_s25] sm:$0xff]   ;;  %vm2658_vm2 = vmmov 0   ;;  %vm801_vm3 = vcmask 261120   ;;  %s3193_s19 = scalar_lea.vmem %s3148_s5, %s2791_s28  ;;  %s2659_s23 = smov 104   ;;  %v861_v33 = vlaneseq }
 0x168   : > { %2447 = vmatprep.subr.bf16.mxu0 %v2657_v18  ;;  %2455 = vmatprep.subr.bf16.mxu1 %v2657_v18  ;;  %v2366_v22 = vld [vmem:[%s3193_s19] ss:$0 sm:$0xff]  ;;  %s2660_s24 = smov 120   ;;  %s2661_s26 = smov 96   ;;  %v2663_v31 = vmov 1983009808  }
 0x169   : > { %2448 = vmatpush3.bf16.msra.mxu0 %v2586_v17  ;;  %2451 = vmatprep.mubr.msk.bf16.mxu0 %vm2658_vm2, %v2657_v18  ;;  %s2662_s2 = smov 112   ;;  %v859_v32 = vunpack.c.l.s4 %v2663_v31  ;;  %v862_v35 = vshrl.u32 %v861_v33, 7  ;;  %v2664_v36 = vmov 1934713408   ;;  %vm1300_vm4 = vcmask 64512   ;;  %s3194_s17 = sld [smem:[#allocation9_spill]] }
 0x16a   : > { %2449 = vmatprep.subr.bf16.mxu0 %v2657_v18  ;;  %2457 = vmatprep.mubr.msk.bf16.mxu1 %vm2658_vm2, %v2657_v18  ;;  %v891_v37 = vunpack.c.l.s4 %v2664_v36  ;;  %vm1536_vm5 = vcmask 1043456   ;;  %s2668_s6 = smov 8   ;;  %s2669_s11 = smov 24   ;;  %vm1867_vm6 = vcmask 130048   ;;  %vm1869_vm7 = vcmask 195584  }
 0x16b   : > { %v860_v34 = vunpack.c.0.s8 %v859_v32  ;;  %s3196_s0 = scalar_lea.vmem %s3150_s7, %s2791_s28  ;;  %s3197_s29 = scalar_lea.vmem %s3151_s8, %s2791_s28  ;;  %vm2077_vm8 = vcmask 523264   ;;  %vm2152_vm9 = vcmask 257024  }
 0x16c   : > { %v892_v43 = vunpack.c.0.s8 %v891_v37  ;;  %s3200_s16 = sld [smem:[#allocation16_spill]] }
 0x16d   : > { %v2876_v20 = vld [vmem:[%s2859_s9] sm:$0xf]  ;;  %2450 = vmatpush3.bf16.msra.mxu0 %v2587_v19  ;;  %v2911_v40 = vsub.s32 %v860_v34, %v862_v35 }
 0x16e   : > { %v2365_v21 = vcombine.low %v2876_v20, %v2876_v20  ;;  %2461 = vmatprep.subr.bf16.mxu0 %v2657_v18  ;;  %v2921_v48 = vsub.s32 %v892_v43, %v862_v35 }
 0x16f   : > { %s3195_s4 = scalar_lea.vmem %s3194_s17, %s3215_s22  ;;  %s2666_s22 = smov 64  }
 0x170   : > { %2452 = vmatmul.mubr.msk.bf16.vlgmr.msra.gmra.mxu0 %vm801_vm3, %v2365_v21 }
 0x171   : > { %2463 = vmatprep.mubr.msk.bf16.mxu0 %vm2658_vm2, %v2657_v18 }
 0x172   : > { %s3201_s17 = scalar_lea.vmem %s3200_s16, %s2791_s28 }
 0x230   : > { %v839_v23 = vpop.f32.mrf.mxu0 }
 0x231   : > { %v2892_v24 = vadd.f32 %v2366_v22, %v839_v23 }
 0x232   : > { %v2453_v25 = vpop.f32.mrf.mxu0 }
 0x233   : > { %853 = vrot.lane.b32.xlu1 %v2892_v24, %s2659_s23  ;;  %847 = vrot.lane.b32.xlu0 %v2892_v24, %s2660_s24  ;;  %s3198_s24 = sld [smem:[#allocation14_spill]] }
 0x234   : > { %v842_v26 = vpop.f32.mrf.mxu0 }
 0x236   : > { %v2454_v27 = vpop.f32.mrf.mxu0 }
 0x237   : > { %994 = vrot.lane.b32.xlu1 %v2892_v24, %s2661_s26  ;;  %850 = vrot.lane.b32.xlu0 %v2892_v24, %s2662_s2 }
 0x2a5   : > { %v2898_v28 = vpop.permute.xlu0 %847  ;;  %v2901_v29 = vpop.permute.xlu1 %853 }
 0x2a6   : > { %996 = vrot.lane.b32.xlu0 %v2898_v28, %s2661_s26  ;;  %v872_v41 = vcombine.low %v2898_v28, %v2901_v29  ;;  %v873_v42 = vcombine.high %v2898_v28, %v2901_v29 }
 0x2a8   : > { %v880_v46 = vrot.slane %v872_v41, %v2911_v40  ;;  %v887_v47 = vrot.slane %v873_v42, %v2911_v40 }
 0x2a9   : > { %v2903_v30 = vpop.permute.xlu0 %850  ;;  %v995_v49 = vpop.permute.xlu1 %994 }
 0x2aa   : > { %1000 = vrot.lane.b32.xlu0 %v2901_v29, %s2661_s26  ;;  %998 = vrot.lane.b32.xlu1 %v2903_v30, %s2661_s26  ;;  %v856_v38 = vcombine.low %v2892_v24, %v2903_v30  ;;  %v857_v39 = vcombine.high %v2892_v24, %v2903_v30  ;;  %s3199_s26 = scalar_lea.vmem %s3198_s24, %s2791_s28 }
 0x2ac   : > { %v864_v44 = vrot.slane %v856_v38, %v2911_v40  ;;  %v871_v45 = vrot.slane %v857_v39, %v2911_v40 }
 0x2ae   : > { %v888_v50 = vcombine.low %v864_v44, %v880_v46  ;;  %v889_v51 = vcombine.high %v864_v44, %v880_v46  ;;  %v904_v52 = vcombine.low %v871_v45, %v887_v47  ;;  %v905_v53 = vcombine.high %v871_v45, %v887_v47 }
 0x2b0   : > { %v896_v55 = vrot.slane %v888_v50, %v2921_v48  ;;  %v903_v56 = vrot.slane %v889_v51, %v2921_v48  ;;  %v912_v57 = vrot.slane %v904_v52, %v2921_v48  ;;  %v919_v58 = vrot.slane %v905_v53, %v2921_v48 }
 0x2b2   : > { %v920_v5 = vcombine.high %v896_v55, %v2657_v18  ;;  %v921_v6 = vcombine.high %v903_v56, %v2657_v18  ;;  %v922_v7 = vcombine.high %v912_v57, %v2657_v18  ;;  %v923_v8 = vcombine.high %v919_v58, %v2657_v18 }
 0x2b3   : > { %v2370_v26 = vpack.c.bf16 %v912_v57, %v896_v55  ;;  %v2371_v27 = vpack.c.bf16 %v919_v58, %v903_v56 }
 0x2b4   : > { %v2372_v17 = vpack.c.bf16 %v922_v7, %v920_v5  ;;  %v2373_v19 = vpack.c.bf16 %v923_v8, %v921_v6 }
 0x2b5   : > { %v939_v42 = vrot.slane %v2370_v26, %v2911_v40  ;;  %v947_v43 = vrot.slane %v2371_v27, %v2911_v40 }
 0x2b6   : > { %v964_v39 = vrot.slane %v2372_v17, %v2911_v40  ;;  %v972_v41 = vrot.slane %v2373_v19, %v2911_v40 }
 0x2b7   : > { %v948_v50 = vcombine.low %v939_v42, %v947_v43 }
 0x318   : > { %v997_v54 = vpop.permute.xlu0 %996 }
 0x31c   : > { %v999_v59 = vpop.permute.xlu1 %998  ;;  %v1001_v60 = vpop.permute.xlu0 %1000 }
 0x31d   : > { %v1006_v61 = vcombine.low %v995_v49, %v999_v59  ;;  %v1007_v62 = vcombine.high %v995_v49, %v999_v59  ;;  %v1022_v63 = vcombine.low %v997_v54, %v1001_v60  ;;  %v1023_v0 = vcombine.high %v997_v54, %v1001_v60 }
 0x31e   : > { %v973_v49 = vcombine.low %v964_v39, %v972_v41  ;;  %v2665_v54 = vmov 0  }
 0x31f   : > { %v1014_v1 = vrot.slane %v1006_v61, %v2911_v40  ;;  %v1021_v2 = vrot.slane %v1007_v62, %v2911_v40  ;;  %v1030_v3 = vrot.slane %v1022_v63, %v2911_v40  ;;  %v1037_v4 = vrot.slane %v1023_v0, %v2911_v40 }
 0x320   : > { %v980_v58 = vrot.slane %v973_v49, %v2921_v48  ;;  %v955_v61 = vrot.slane %v948_v50, %v2921_v48 }
 0x321   : > { %v1038_v9 = vcombine.low %v1014_v1, %v1030_v3  ;;  %v1039_v10 = vcombine.high %v1014_v1, %v1030_v3  ;;  %v1054_v11 = vcombine.low %v1021_v2, %v1037_v4  ;;  %v1055_v12 = vcombine.high %v1021_v2, %v1037_v4 }
 0x322   : > { %v986_v0 = vshrl.u32 %v980_v58, 16  ;;  %v984_v2 = vpack.i.b16 %v980_v58, %v955_v61  ;;  %v985_v3 = vshrl.u32 %v955_v61, 16  ;;  %v981_v7 = vcombine.high %v980_v58, %v2665_v54 }
 0x323   : > { %v1046_v13 = vrot.slane %v1038_v9, %v2921_v48  ;;  %v1053_v14 = vrot.slane %v1039_v10, %v2921_v48  ;;  %v1062_v15 = vrot.slane %v1054_v11, %v2921_v48  ;;  %v1069_v16 = vrot.slane %v1055_v12, %v2921_v48 }
 0x324   : > { %v987_v6 = vpack.i.b16 %v986_v0, %v985_v3  ;;  %v956_v9 = vcombine.high %v955_v61, %v2665_v54  ;;  %v992_v10 = vshrl.u32 %v981_v7, 16 }
 0x325   : > { %v1070_v21 = vcombine.high %v1046_v13, %v2657_v18  ;;  %v1071_v22 = vcombine.high %v1053_v14, %v2657_v18  ;;  %v1072_v23 = vcombine.high %v1062_v15, %v2657_v18  ;;  %v1073_v25 = vcombine.high %v1069_v16, %v2657_v18 }
 0x326   : > { %v2374_v31 = vpack.c.bf16 %v1062_v15, %v1046_v13  ;;  %v2375_v32 = vpack.c.bf16 %v1069_v16, %v1053_v14  ;;  %v990_v11 = vpack.i.b16 %v981_v7, %v956_v9  ;;  %v991_v12 = vshrl.u32 %v956_v9, 16  ;;  %v2382_v14 = vld [vmem:[%s3195_s4] ss:$0 sm:$0xff] }
 0x327   : > { %v2376_v33 = vpack.c.bf16 %v1072_v23, %v1070_v21  ;;  %v2377_v34 = vpack.c.bf16 %v1073_v25, %v1071_v22 }
 0x328   : > { %v1089_v35 = vrot.slane %v2374_v31, %v2911_v40  ;;  %v1097_v36 = vrot.slane %v2375_v32, %v2911_v40  ;;  %v993_v13 = vpack.i.b16 %v992_v10, %v991_v12 }
 0x329   : > { %v1114_v37 = vrot.slane %v2376_v33, %v2911_v40  ;;  %v1122_v38 = vrot.slane %v2377_v34, %v2911_v40 }
 0x32a   : > { %v1098_v44 = vcombine.low %v1089_v35, %v1097_v36 }
 0x32b   : > { %v1123_v45 = vcombine.low %v1114_v37, %v1122_v38 }
 0x32c   : > { %v1105_v46 = vrot.slane %v1098_v44, %v2921_v48 }
 0x32d   : > { %v1130_v47 = vrot.slane %v1123_v45, %v2921_v48 }
 0x32e   : > { %v1135_v52 = vshrl.u32 %v1105_v46, 16  ;;  %v1106_v59 = vcombine.high %v1105_v46, %v2665_v54 }
 0x32f   : > { %v1134_v51 = vpack.i.b16 %v1130_v47, %v1105_v46  ;;  %v1136_v53 = vshrl.u32 %v1130_v47, 16  ;;  %v1131_v55 = vcombine.high %v1130_v47, %v2665_v54 }
 0x330   : > { %v1141_v1 = vshrl.u32 %v1106_v59, 16 }
 0x331   : > { %v1305_v56 = vsel %vm1300_vm4, %v1134_v51, 0  ;;  %v1137_v57 = vpack.i.b16 %v1136_v53, %v1135_v52  ;;  %v1142_v62 = vshrl.u32 %v1131_v55, 16  ;;  %v1140_v63 = vpack.i.b16 %v1131_v55, %v1106_v59 }
 0x332   : > { %2456 = vmatpush3.bf16.xpose.msra.mxu1 %v1305_v56 }
 0x333   : > { %v1351_v60 = vsel %vm1300_vm4, %v1137_v57, 0  ;;  %2467 = vmatprep.subr.bf16.mxu1 %v2657_v18  ;;  %v1143_v4 = vpack.i.b16 %v1142_v62, %v1141_v1  ;;  %v1397_v5 = vsel %vm1300_vm4, %v1140_v63, 0 }
 0x334   : > { %2462 = vmatpush3.bf16.xpose.msra.mxu0 %v1351_v60 }
 0x335   : > { %2473 = vmatprep.subr.bf16.mxu0 %v2657_v18  ;;  %v1443_v8 = vsel %vm1300_vm4, %v1143_v4, 0 }
 0x339   : > { %2458 = vmatmul.mubr.msk.bf16.vlgmr.msra.gmra.mxu1 %vm1300_vm4, %v984_v2 }
 0x33a   : > { %2468 = vmatpush3.bf16.xpose.msra.mxu1 %v1397_v5  ;;  %2469 = vmatprep.mubr.msk.bf16.mxu1 %vm2658_vm2, %v2657_v18 }
 0x33b   : > { %2464 = vmatmul.mubr.msk.bf16.vlgmr.msra.gmra.mxu0 %vm1300_vm4, %v987_v6  ;;  %2479 = vmatprep.subr.bf16.mxu1 %v2657_v18 }
 0x33c   : > { %2474 = vmatpush3.bf16.xpose.msra.mxu0 %v1443_v8  ;;  %2475 = vmatprep.mubr.msk.bf16.mxu0 %vm2658_vm2, %v2657_v18 }
 0x33d   : > { %2485 = vmatprep.subr.bf16.mxu0 %v2657_v18 }
 0x341   : > { %2470 = vmatmul.mubr.msk.bf16.vlgmr.msra.gmra.mxu1 %vm1300_vm4, %v990_v11 }
 0x342   : > { %2481 = vmatprep.mubr.msk.bf16.mxu1 %vm2658_vm2, %v2657_v18 }
 0x343   : > { %2476 = vmatmul.mubr.msk.bf16.vlgmr.msra.gmra.mxu0 %vm1300_vm4, %v993_v13 }
 0x344   : > { %2487 = vmatprep.mubr.msk.bf16.mxu0 %vm2658_vm2, %v2657_v18 }
 0x3f9   : > { %v1341_v15 = vpop.f32.mrf.mxu1 }
 0x3fa   : > { %v1342_v16 = vadd.f32 %v2382_v14, %v1341_v15 }
 0x3fb   : > { %v2459_v17 = vpop.f32.mrf.mxu1  ;;  %v1387_v19 = vpop.f32.mrf.mxu0 }
 0x3fc   : > { %v1388_v21 = vadd.f32 %v2382_v14, %v1387_v19  ;;  %v1485_v22 = vsel %vm1300_vm4, %v1342_v16, -inf }
 0x3fd   : > { %1486 = vmax.xlane.f32.xlu1 %v1485_v22  ;;  %v1344_v23 = vpop.f32.mrf.mxu1  ;;  %v2465_v25 = vpop.f32.mrf.mxu0 }
 0x3fe   : > { %v1488_v26 = vsel %vm1300_vm4, %v1388_v21, -inf }
 0x3ff   : > { %v2460_v27 = vpop.f32.mrf.mxu1  ;;  %1489 = vmax.xlane.f32.xlu0 %v1488_v26  ;;  %v1390_v31 = vpop.f32.mrf.mxu0 }
 0x401   : > { %v2466_v32 = vpop.f32.mrf.mxu0  ;;  %v1433_v33 = vpop.f32.mrf.mxu1 }
 0x402   : > { %v1434_v34 = vadd.f32 %v2382_v14, %v1433_v33 }
 0x403   : > { %v2471_v35 = vpop.f32.mrf.mxu1  ;;  %v1479_v36 = vpop.f32.mrf.mxu0 }
 0x404   : > { %v1480_v37 = vadd.f32 %v2382_v14, %v1479_v36  ;;  %v1491_v38 = vsel %vm1300_vm4, %v1434_v34, -inf }
 0x405   : > { %v1436_v39 = vpop.f32.mrf.mxu1  ;;  %1492 = vmax.xlane.f32.xlu0 %v1491_v38  ;;  %v2477_v41 = vpop.f32.mrf.mxu0 }
 0x406   : > { %v1494_v42 = vsel %vm1300_vm4, %v1480_v37, -inf }
 0x407   : > { %v2472_v43 = vpop.f32.mrf.mxu1  ;;  %1495 = vmax.xlane.f32.xlu1 %v1494_v42  ;;  %v1482_v44 = vpop.f32.mrf.mxu0 }
 0x409   : > { %v2478_v45 = vpop.f32.mrf.mxu0 }
 0x418   : > { %1146 = vrot.lane.b32.xlu1 %v2898_v28, %s2666_s22 }
 0x41b   : > { %1144 = vrot.lane.b32.xlu0 %v2892_v24, %s2666_s22 }
 0x486   : > { %v1487_v46 = vpop.xlane.xlu1 %1486 }
 0x487   : > { %v1497_v47 = vsub.f32 %v1342_v16, %v1487_v46 }
 0x488   : > { %v1490_v49 = vpop.xlane.xlu0 %1489 }
 0x489   : > { %v1501_v50 = vmul.f32 1.442695, %v1497_v47  ;;  %v1498_v51 = vsub.f32 %v1388_v21, %v1490_v49 }
 0x48b   : > { %2597 = vpow2.f32 %v1501_v50  ;;  %v1503_v52 = vmul.f32 1.442695, %v1498_v51 }
 0x48d   : > { %2599 = vpow2.f32 %v1503_v52 }
 0x48e   : > { %v1493_v57 = vpop.xlane.xlu0 %1492 }
 0x48f   : > { %v1499_v59 = vsub.f32 %v1434_v34, %v1493_v57 }
 0x490   : > { %v1496_v24 = vpop.xlane.xlu1 %1495 }
 0x491   : > { %v1500_v58 = vsub.f32 %v1480_v37, %v1496_v24  ;;  %v1505_v61 = vmul.f32 1.442695, %v1499_v59 }
 0x493   : > { %v1507_v60 = vmul.f32 1.442695, %v1500_v58 }
 0x494   : > { %v1147_v1 = vpop.permute.xlu1 %1146 }
 0x495   : > { %2601 = vpow2.f32 %v1507_v60 }
 0x496   : > { %2603 = vpow2.f32 %v1505_v61 }
 0x498   : > { %v2990_v53 = vpop.eup %2597 }
 0x499   : > { %v1509_v55 = vsel %vm1300_vm4, %v2990_v53, 0.0 }
 0x49a   : > { %v2994_v56 = vpop.eup %2599  ;;  %1510 = vadd.xlane.f32.xlu0 %v1509_v55 }
 0x49b   : > { %v1512_v28 = vsel %vm1300_vm4, %v2994_v56, 0.0 }
 0x49c   : > { %1513 = vadd.xlane.f32.xlu1 %v1512_v28 }
 0x4a2   : > { %v3000_v62 = vpop.eup %2601 }
 0x4a3   : > { %v3002_v63 = vpop.eup %2603  ;;  %v1518_v0 = vsel %vm1300_vm4, %v3000_v62, 0.0 }
 0x4ad   : > { %1148 = vrot.lane.b32.xlu1 %v2903_v30, %s2666_s22  ;;  %v1515_v30 = vsel %vm1300_vm4, %v3002_v63, 0.0 }
 0x4b0   : > { %1150 = vrot.lane.b32.xlu0 %v2901_v29, %s2666_s22  ;;  %v1145_v29 = vpop.permute.xlu0 %1144 }
 0x4cf   : > { %1519 = vadd.xlane.f32.xlu0 %v1518_v0 }
 0x4d1   : > { %1516 = vadd.xlane.f32.xlu1 %v1515_v30 }
 0x523   : > { %v1511_v2 = vpop.xlane.xlu0 %1510 }
 0x524   : > { %2605 = vrcp.f32 %v1511_v2 }
 0x525   : > { %v1514_v3 = vpop.xlane.xlu1 %1513 }
 0x526   : > { %2607 = vrcp.f32 %v1514_v3 }
 0x527   : > { %v1151_v4 = vpop.permute.xlu0 %1150 }
 0x528   : > { %v1172_v5 = vcombine.low %v1147_v1, %v1151_v4  ;;  %v1173_v6 = vcombine.high %v1147_v1, %v1151_v4 }
 0x529   : > { %v1149_v7 = vpop.permute.xlu1 %1148 }
 0x52a   : > { %v1156_v8 = vcombine.low %v1145_v29, %v1149_v7  ;;  %v1157_v9 = vcombine.high %v1145_v29, %v1149_v7  ;;  %v1180_v10 = vrot.slane %v1172_v5, %v2911_v40  ;;  %v1187_v11 = vrot.slane %v1173_v6, %v2911_v40 }
 0x52c   : > { %v1164_v12 = vrot.slane %v1156_v8, %v2911_v40  ;;  %v1171_v13 = vrot.slane %v1157_v9, %v2911_v40 }
 0x52e   : > { %v1188_v14 = vcombine.low %v1164_v12, %v1180_v10  ;;  %v1189_v15 = vcombine.high %v1164_v12, %v1180_v10  ;;  %v1204_v16 = vcombine.low %v1171_v13, %v1187_v11  ;;  %v1205_v17 = vcombine.high %v1171_v13, %v1187_v11 }
 0x530   : > { %v1196_v19 = vrot.slane %v1188_v14, %v2921_v48  ;;  %v1203_v21 = vrot.slane %v1189_v15, %v2921_v48  ;;  %v1212_v22 = vrot.slane %v1204_v16, %v2921_v48  ;;  %v1219_v23 = vrot.slane %v1205_v17, %v2921_v48 }
 0x531   : > { %v2606_v42 = vpop.eup %2605 }
 0x532   : > { %v1220_v25 = vcombine.high %v1196_v19, %v2657_v18  ;;  %v1221_v26 = vcombine.high %v1203_v21, %v2657_v18  ;;  %v1222_v27 = vcombine.high %v1212_v22, %v2657_v18  ;;  %v1223_v31 = vcombine.high %v1219_v23, %v2657_v18 }
 0x533   : > { %v2378_v32 = vpack.c.bf16 %v1212_v22, %v1196_v19  ;;  %v2379_v33 = vpack.c.bf16 %v1219_v23, %v1203_v21  ;;  %v2608_v45 = vpop.eup %2607  ;;  %v1525_v47 = vmul.f32 %v2606_v42, %v2990_v53 }
 0x534   : > { %v2380_v34 = vpack.c.bf16 %v1222_v27, %v1220_v25  ;;  %v2381_v35 = vpack.c.bf16 %v1223_v31, %v1221_v26  ;;  %v1526_v28 = vmul.f32 %v2608_v45, %v2994_v56 }
 0x535   : > { %v1239_v36 = vrot.slane %v2378_v32, %v2911_v40  ;;  %v1247_v37 = vrot.slane %v2379_v33, %v2911_v40  ;;  %v1529_v0 = vpack.c.bf16 %v1525_v47, %v1525_v47 }
 0x536   : > { %v1264_v38 = vrot.slane %v2380_v34, %v2911_v40  ;;  %v1272_v39 = vrot.slane %v2381_v35, %v2911_v40  ;;  %v1530_v30 = vpack.c.bf16 %v1526_v28, %v1526_v28 }
 0x537   : > { %v1248_v41 = vcombine.low %v1239_v36, %v1247_v37 }
 0x538   : > { %v1273_v43 = vcombine.low %v1264_v38, %v1272_v39  ;;  %v2589_v39 = vld [vmem:[%s2814_s30 + $0x8] sm:$0xff]  }
 0x539   : > { %v1255_v44 = vrot.slane %v1248_v41, %v2921_v48 }
 0x53a   : > { %v1280_v46 = vrot.slane %v1273_v43, %v2921_v48 }
 0x53b   : > { %v1256_v49 = vcombine.high %v1255_v44, %v2665_v54  ;;  %v1285_v51 = vshrl.u32 %v1255_v44, 16 }
 0x53c   : > { %v1284_v50 = vpack.i.b16 %v1280_v46, %v1255_v44  ;;  %v1286_v52 = vshrl.u32 %v1280_v46, 16  ;;  %v1281_v55 = vcombine.high %v1280_v46, %v2665_v54 }
 0x53d   : > { %v1291_v24 = vshrl.u32 %v1256_v49, 16 }
 0x53e   : > { %v1538_v57 = vsel %vm1536_vm5, %v1284_v50, 0  ;;  %v1287_v58 = vpack.i.b16 %v1286_v52, %v1285_v51  ;;  %v1290_v59 = vpack.i.b16 %v1281_v55, %v1256_v49  ;;  %v1292_v60 = vshrl.u32 %v1281_v55, 16  ;;  %v2590_v51 = vld [vmem:[%s2814_s30] sm:$0xff]   ;;  %s2667_s30 = smov 16  }
 0x53f   : > { %2480 = vmatpush3.bf16.msra.mxu1 %v1538_v57 }
 0x540   : > { %v1584_v61 = vsel %vm1536_vm5, %v1287_v58, 0  ;;  %2491 = vmatprep.subr.bf16.mxu1 %v2657_v18  ;;  %v1293_v53 = vpack.i.b16 %v1292_v60, %v1291_v24  ;;  %v1630_v54 = vsel %vm1536_vm5, %v1290_v59, 0 }
 0x541   : > { %2486 = vmatpush3.bf16.msra.mxu0 %v1584_v61 }
 0x542   : > { %2482 = vmatmul.mubr.msk.bf16.vlgmr.msra.gmra.mxu1 %vm1300_vm4, %v1529_v0  ;;  %2497 = vmatprep.subr.bf16.mxu0 %v2657_v18  ;;  %v1676_v56 = vsel %vm1536_vm5, %v1293_v53, 0 }
 0x543   : > { %2492 = vmatpush3.bf16.msra.mxu1 %v1630_v54  ;;  %2493 = vmatprep.mubr.msk.bf16.mxu1 %vm2658_vm2, %v2657_v18 }
 0x544   : > { %2488 = vmatmul.mubr.msk.bf16.vlgmr.msra.gmra.mxu0 %vm1300_vm4, %v1530_v30  ;;  %2503 = vmatprep.subr.bf16.mxu1 %v2657_v18 }
 0x545   : > { %2498 = vmatpush3.bf16.msra.mxu0 %v1676_v56  ;;  %2499 = vmatprep.mubr.msk.bf16.mxu0 %vm2658_vm2, %v2657_v18 }
 0x546   : > { %2511 = vmatprep.subr.bf16.mxu0 %v2657_v18 }
 0x558   : > { %v1520_v29 = vpop.xlane.xlu0 %1519 }
 0x559   : > { %2609 = vrcp.f32 %v1520_v29 }
 0x55a   : > { %v1517_v1 = vpop.xlane.xlu1 %1516 }
 0x55b   : > { %2611 = vrcp.f32 %v1517_v1 }
 0x566   : > { %v2610_v2 = vpop.eup %2609 }
 0x567   : > { %v1528_v3 = vmul.f32 %v2610_v2, %v3000_v62 }
 0x568   : > { %v2612_v4 = vpop.eup %2611 }
 0x569   : > { %v1532_v5 = vpack.c.bf16 %v1528_v3, %v1528_v3  ;;  %v1527_v6 = vmul.f32 %v2612_v4, %v3002_v63 }
 0x56b   : > { %2500 = vmatmul.mubr.msk.bf16.vlgmr.msra.gmra.mxu0 %vm1300_vm4, %v1532_v5  ;;  %v1531_v7 = vpack.c.bf16 %v1527_v6, %v1527_v6 }
 0x56c   : > { %2515 = vmatprep.mubr.msk.bf16.mxu0 %vm2658_vm2, %v2657_v18 }
 0x56d   : > { %2494 = vmatmul.mubr.msk.bf16.vlgmr.msra.gmra.mxu1 %vm1300_vm4, %v1531_v7  ;;  %v2393_v7 = vld [vmem:[%s3196_s0] ss:$0 sm:$0xff] }
 0x56e   : > { %2507 = vmatprep.mubr.msk.bf16.mxu1 %vm2658_vm2, %v2657_v18  ;;  %2504 = vmatpush3.bf16.msra.mxu1 %v2589_v39  ;;  %v2596_v39 = vld [vmem:[%s2845_s20] sm:$0xff]  }
 0x56f   : > { %2505 = vmatprep.subr.bf16.mxu1 %v2657_v18 }
 0x572   : > { %2506 = vmatpush3.bf16.msra.mxu1 %v2590_v51 }
 0x573   : > { %2519 = vmatprep.subr.bf16.mxu1 %v2657_v18 }
 0x602   : > { %v1574_v8 = vpop.f32.mrf.mxu1 }
 0x604   : > { %v2483_v9 = vpop.f32.mrf.mxu1  ;;  %v1620_v10 = vpop.f32.mrf.mxu0 }
 0x606   : > { %v1577_v11 = vpop.f32.mrf.mxu1  ;;  %v2489_v62 = vpop.f32.mrf.mxu0 }
 0x608   : > { %v2484_v12 = vpop.f32.mrf.mxu1  ;;  %v1623_v13 = vpop.f32.mrf.mxu0 }
 0x60a   : > { %v2490_v14 = vpop.f32.mrf.mxu0 }
 0x62b   : > { %v1712_v63 = vpop.f32.mrf.mxu0 }
 0x62c   : > { %v1734_v15 = vcombine.low %v1620_v10, %v1712_v63  ;;  %v1735_v16 = vcombine.high %v1620_v10, %v1712_v63 }
 0x62d   : > { %v1666_v17 = vpop.f32.mrf.mxu1  ;;  %v2501_v19 = vpop.f32.mrf.mxu0 }
 0x62e   : > { %v1718_v21 = vcombine.low %v1574_v8, %v1666_v17  ;;  %v1719_v22 = vcombine.high %v1574_v8, %v1666_v17  ;;  %v1742_v26 = vrot.slane %v1734_v15, %v2911_v40  ;;  %v1749_v27 = vrot.slane %v1735_v16, %v2911_v40 }
 0x62f   : > { %v2495_v23 = vpop.f32.mrf.mxu1  ;;  %v1715_v25 = vpop.f32.mrf.mxu0  ;;  %v776_v8 = vunpack.c.l.bf16 %v2876_v20  ;;  %v2591_v20 = vld [vmem:[%s2831_s3 + $0x8] sm:$0xff]  }
 0x630   : > { %v1726_v31 = vrot.slane %v1718_v21, %v2911_v40  ;;  %v1733_v32 = vrot.slane %v1719_v22, %v2911_v40  ;;  %2512 = vmatpush3.bf16.msra.mxu0 %v2591_v20  ;;  %v2592_v21 = vld [vmem:[%s2831_s3] sm:$0xff]   ;;  %v2593_v22 = vld [vmem:[%s2845_s20 + $0x18] sm:$0xff]   ;;  %v2594_v23 = vld [vmem:[%s2845_s20 + $0x10] sm:$0xff]  }
 0x631   : > { %v1669_v33 = vpop.f32.mrf.mxu1  ;;  %v2502_v34 = vpop.f32.mrf.mxu0  ;;  %2513 = vmatprep.subr.bf16.mxu0 %v2657_v18 }
 0x632   : > { %v1750_v35 = vcombine.low %v1726_v31, %v1742_v26  ;;  %v1751_v36 = vcombine.high %v1726_v31, %v1742_v26  ;;  %v1766_v37 = vcombine.low %v1733_v32, %v1749_v27  ;;  %v1767_v38 = vcombine.high %v1733_v32, %v1749_v27  ;;  %v2397_v32 = vld [vmem:[%s3197_s29] ss:$0 sm:$0xff] }
 0x633   : > { %v2496_v41 = vpop.f32.mrf.mxu1  ;;  %v2398_v34 = vld [vmem:[%s3199_s26] ss:$0 sm:$0xff] }
 0x634   : > { %v1758_v42 = vrot.slane %v1750_v35, %v2921_v48  ;;  %v1765_v43 = vrot.slane %v1751_v36, %v2921_v48  ;;  %v1774_v44 = vrot.slane %v1766_v37, %v2921_v48  ;;  %v1781_v45 = vrot.slane %v1767_v38, %v2921_v48  ;;  %2514 = vmatpush3.bf16.msra.mxu0 %v2592_v21  ;;  %v2595_v38 = vld [vmem:[%s2845_s20 + $0x8] sm:$0xff]   ;;  %v2399_v41 = vld [vmem:[%s3201_s17] ss:$0 sm:$0xff] }
 0x636   : > { %v1786_v46 = vcombine.low %v1758_v42, %v1765_v43  ;;  %v2391_v47 = vcombine.high %v1758_v42, %v1765_v43  ;;  %v1802_v49 = vcombine.low %v1774_v44, %v1781_v45  ;;  %v2392_v50 = vcombine.high %v1774_v44, %v1781_v45 }
 0x638   : > { %v1793_v52 = vrot.slane %v1786_v46, %v2911_v40  ;;  %v1801_v55 = vrot.slane %v2391_v47, %v2911_v40  ;;  %v1809_v28 = vrot.slane %v1802_v49, %v2911_v40  ;;  %v1817_v24 = vrot.slane %v2392_v50, %v2911_v40 }
 0x63a   : > { %v1819_v57 = vcombine.high %v1793_v52, %v1801_v55  ;;  %v1835_v58 = vcombine.high %v1809_v28, %v1817_v24  ;;  %v1818_v59 = vcombine.low %v1793_v52, %v1801_v55  ;;  %v1834_v60 = vcombine.low %v1809_v28, %v1817_v24 }
 0x63c   : > { %v1833_v61 = vrot.slane %v1819_v57, %v2921_v48  ;;  %v1849_v0 = vrot.slane %v1835_v58, %v2921_v48  ;;  %v1826_v53 = vrot.slane %v1818_v59, %v2921_v48  ;;  %v1842_v54 = vrot.slane %v1834_v60, %v2921_v48 }
 0x63e   : > { %v1852_v30 = vcombine.low %v1833_v61, %v1849_v0  ;;  %v1851_v56 = vcombine.high %v1826_v53, %v1842_v54  ;;  %v1850_v29 = vcombine.low %v1826_v53, %v1842_v54  ;;  %v1853_v40 = vcombine.high %v1833_v61, %v1849_v0 }
 0x640   : > { %1859 = vrot.lane.b32.xlu1 %v1852_v30, %s2667_s30  ;;  %1855 = vrot.lane.b32.xlu0 %v1851_v56, %s2668_s6 }
 0x644   : > { %1863 = vrot.lane.b32.xlu1 %v1853_v40, %s2669_s11 }
 0x6b2   : > { %v1860_v1 = vpop.permute.xlu1 %1859  ;;  %v1856_v2 = vpop.permute.xlu0 %1855 }
 0x6b3   : > { %v1866_v3 = vsel %vm1300_vm4, %v1850_v29, %v1856_v2  ;;  %v2409_v29 = vld [vmem:[%s727_s1] ss:$0 sm:$0xff] }
 0x6b4   : > { %v1868_v5 = vsel %vm1867_vm6, %v1866_v3, %v1860_v1  ;;  %v2410_v1 = vld [vmem:[%s730_s10] ss:$0 sm:$0xff] }
 0x6b6   : > { %v1864_v4 = vpop.permute.xlu1 %1863 }
 0x6b7   : > { %v1870_v48 = vsel %vm1869_vm7, %v1868_v5, %v1864_v4 }
 0x6b8   : > { %v1871_v6 = vpack.c.bf16 %v1870_v48, %v1870_v48 }
 0x6ba   : > { %2508 = vmatmul.mubr.msk.bf16.vlgmr.msra.gmra.mxu1 %vm801_vm3, %v1871_v6 }
 0x6bb   : > { %2527 = vmatprep.mubr.msk.bf16.mxu1 %vm2658_vm2, %v2657_v18  ;;  %2520 = vmatpush3.bf16.msra.mxu1 %v2593_v22 }
 0x6bc   : > { %2521 = vmatprep.subr.bf16.mxu1 %v2657_v18 }
 0x6bf   : > { %2522 = vmatpush3.bf16.msra.mxu1 %v2594_v23 }
 0x6c0   : > { %2523 = vmatprep.subr.bf16.mxu1 %v2657_v18 }
 0x6c3   : > { %2524 = vmatpush3.bf16.msra.mxu1 %v2595_v38 }
 0x6c4   : > { %2525 = vmatprep.subr.bf16.mxu1 %v2657_v18  ;;  %v2403_v18 = vld [vmem:[%s724_s18] ss:$0 sm:$0xff] }
 0x6c7   : > { %2526 = vmatpush3.bf16.msra.mxu1 %v2596_v39 }
 0x77a   : > { %v1932_v9 = vpop.f32.mrf.mxu1 }
 0x77b   : > { %v1933_v10 = vadd.f32 %v2393_v7, %v1932_v9 }
 0x77c   : > { %v2509_v11 = vpop.f32.mrf.mxu1 }
 0x77d   : > { %v1938_v62 = vadd.f32 %v1933_v10, %v776_v8 }
 0x77e   : > { %v1935_v12 = vpop.f32.mrf.mxu1 }
 0x77f   : > { %v1941_v13 = vsel %vm801_vm3, %v1938_v62, 0.0 }
 0x780   : > { %v2510_v14 = vpop.f32.mrf.mxu1  ;;  %1942 = vadd.xlane.f32.xlu0 %v1941_v13 }
 0x809   : > { %v1943_v63 = vpop.xlane.xlu0 %1942 }
 0x80a   : > { %v1945_v15 = vmul.f32 0.03125, %v1943_v63 }
 0x80c   : > { %v1946_v16 = vsub.f32 %v1938_v62, %v1945_v15 }
 0x80e   : > { %v1947_v17 = vmul.f32 %v1946_v16, %v1946_v16 }
 0x810   : > { %v1948_v19 = vsel %vm801_vm3, %v1947_v17, 0.0 }
 0x811   : > { %1949 = vadd.xlane.f32.xlu1 %v1948_v19 }
 0x89a   : > { %v1950_v25 = vpop.xlane.xlu1 %1949 }
 0x89b   : > { %v1951_v26 = vmul.f32 0.03125, %v1950_v25 }
 0x89d   : > { %v1952_v27 = vadd.f32 1e-12, %v1951_v26 }
 0x89f   : > { %2613 = vrsqrt.f32 %v1952_v27 }
 0x8ac   : > { %v2614_v31 = vpop.eup %2613 }
 0x8ad   : > { %v1954_v33 = vmul.f32 %v2614_v31, %v1946_v16 }
 0x8af   : > { %v1961_v35 = vmul.f32 %v2397_v32, %v1954_v33 }
 0x8b1   : > { %v1968_v36 = vadd.f32 %v2398_v34, %v1961_v35 }
 0x8b3   : > { %v1969_v37 = vpack.c.bf16 %v1968_v36, %v1968_v36 }
 0x8b5   : > { %2516 = vmatmul.mubr.msk.bf16.vlgmr.msra.gmra.mxu0 %vm801_vm3, %v1969_v37 }
 0x975   : > { %v2030_v42 = vpop.f32.mrf.mxu0 }
 0x976   : > { %v2031_v43 = vadd.f32 %v2399_v41, %v2030_v42 }
 0x977   : > { %v2517_v44 = vpop.f32.mrf.mxu0 }
 0x978   : > { %v2036_v45 = vmax.f32 %v2031_v43, 0.0 }
 0x979   : > { %v2033_v46 = vpop.f32.mrf.mxu0 }
 0x97a   : > { %v2037_v47 = vpack.c.bf16 %v2036_v45, %v2036_v45 }
 0x97b   : > { %v2518_v49 = vpop.f32.mrf.mxu0 }
 0x97c   : > { %2528 = vmatmul.mubr.msk.bf16.vlgmr.msra.gmra.mxu1 %vm2077_vm8, %v2037_v47 }
 0xa3c   : > { %v2115_v50 = vpop.f32.mrf.mxu1 }
 0xa3d   : > { %v2116_v51 = vadd.f32 %v2403_v18, %v2115_v50 }
 0xa3e   : > { %v2529_v52 = vpop.f32.mrf.mxu1 }
 0xa3f   : > { %v2121_v55 = vadd.f32 %v2116_v51, %v1968_v36 }
 0xa40   : > { %v2118_v28 = vpop.f32.mrf.mxu1 }
 0xa41   : > { %v2124_v24 = vsel %vm801_vm3, %v2121_v55, 0.0 }
 0xa42   : > { %2125 = vadd.xlane.f32.xlu0 %v2124_v24  ;;  %v2530_v57 = vpop.f32.mrf.mxu1 }
 0xacb   : > { %v2126_v58 = vpop.xlane.xlu0 %2125 }
 0xacc   : > { %v2127_v59 = vmul.f32 0.03125, %v2126_v58 }
 0xace   : > { %v2128_v60 = vsub.f32 %v2121_v55, %v2127_v59 }
 0xad0   : > { %v2129_v61 = vmul.f32 %v2128_v60, %v2128_v60 }
 0xad2   : > { %v2130_v0 = vsel %vm801_vm3, %v2129_v61, 0.0 }
 0xad3   : > { %2131 = vadd.xlane.f32.xlu0 %v2130_v0 }
 0xb5c   : > { %v2132_v53 = vpop.xlane.xlu0 %2131 }
 0xb5d   : > { %v2133_v54 = vmul.f32 0.03125, %v2132_v53 }
 0xb5f   : > { %v2134_v30 = vadd.f32 1e-12, %v2133_v54 }
 0xb61   : > { %2615 = vrsqrt.f32 %v2134_v30 }
 0xb6e   : > { %v2616_v56 = vpop.eup %2615 }
 0xb6f   : > { %v2136_v40 = vmul.f32 %v2616_v56, %v2128_v60 }
 0xb71   : > { %v2143_v2 = vmul.f32 %v2409_v29, %v2136_v40 }
 0xb73   : > { %v2150_v3 = vadd.f32 %v2410_v1, %v2143_v2 }
 0xb75   : > { %v2151_v4 = vpack.c.bf16 %v2150_v3, %v2150_v3 }
 0xb77   : > { %2153 = vst.msk [vmem:[%s2859_s9] sm:$0xf] %vm2152_vm9, %v2151_v4 }
 0xb78 PF: > { %s3203_s21 = sld [smem:[#allocation5_spill]] }
 0xb79   : > { %s3205_s22 = sld [smem:[#allocation4_spill]] }
 0xb7a   : > { %s3206_s23 = sld [smem:[#allocation6_spill]] }
 0xb7b   : > { %s3207_s24 = sld [smem:[#allocation7_spill]] }
 0xb7e   : > { %s26_s25 = sadd.s32 1, %s3203_s21   ;;  %s3204_s21 = sld [smem:[#allocation3_spill]] }
 0xb7f   : > { %p23_p8 = scmp.ge.s32.totalorder %s26_s25, 6  }
 0xb81   :  { %25 = sbr.rel (!%p23_p8) target bundleno = 12 (0xc), region = 157 }

</bundles_post_ra>
